<compile_context>
chip_gen: v5e
topology: v5e:2x2
jax: 0.10.0
libtpu: 0.0.40
codegen_flags: <defaults>
</compile_context>

<pallas_src>
import jax
import jax.numpy as jnp
from jax.experimental import pallas as pl
from jax.experimental.pallas import tpu as pltpu

NEG_SLOPE = 0.01  # PyTorch LeakyReLU default negative_slope
BN_EPS = 1e-5     # PyTorch BatchNorm2d default eps


def up_conv_kernel(xp_ref, w_ref, b_ref, o_ref, patch_ref):
    """One (batch, row-phase) pair per grid step.

    xp_ref    : (1, H+2, W+2, Cin)   zero-padded ORIGINAL-resolution input (NHWC)
    w_ref     : (1, 2, 4*Cin, Cout)  phase-decomposed weights for this row-phase
                                     (dim 1 = column phase, K ordered (r, s, ci))
    b_ref     : (1, Cout)            folded bias (conv bias + BN shift)
    o_ref     : (1, 1, 2, H, W, Cout) output block: [n, a, b, i, j, co]
    patch_ref : (H, W, 4*Cin)        VMEM im2col scratch
    """
    a = pl.program_id(1)                      # row phase (0 or 1)
    _, Hp, Wp, Cin = xp_ref.shape
    H, W = Hp - 2, Wp - 2
    Cout = o_ref.shape[-1]

    bias = b_ref[...].astype(jnp.float32)     # (1, Cout)

    for b in range(2):                        # column phase (static -> static W slices)
        # Gather the 4 taps of this phase into one (H, W, 4*Cin) patch so the conv
        # becomes a single K=4*Cin matmul (instead of 4 tiny-K dots).
        for t, (r, s) in enumerate(((0, 0), (0, 1), (1, 0), (1, 1))):
            patch_ref[:, :, t * Cin:(t + 1) * Cin] = (
                xp_ref[0, pl.ds(a + r, H), pl.ds(b + s, W), :])

        patch = patch_ref[...].reshape(H * W, 4 * Cin)
        acc = jnp.dot(patch, w_ref[0, b], preferred_element_type=jnp.float32)

        y = acc + bias                                        # folded conv-bias + BN shift
        y = jnp.where(y > 0, y, NEG_SLOPE * y)                # LeakyReLU
        o_ref[0, 0, b] = y.reshape(H, W, Cout).astype(o_ref.dtype)


def up_conv_forward(x_nchw, weight, bias, gamma, beta, running_mean, running_var,
                    eps=BN_EPS):
    """Forward pass matching the PyTorch up_conv module (BatchNorm in eval mode).

    x_nchw : (N, Cin, H, W)
    weight : (Cout, Cin, 3, 3)  (PyTorch conv weight layout)
    bias, gamma, beta, running_mean, running_var : (Cout,)
    returns (N, Cout, 2H, 2W)
    """
    N, Cin, H, W = x_nchw.shape
    Cout = weight.shape[0]

    # ---- Fold conv bias + BatchNorm (running stats) into weights and a shift -------------
    #   y = gamma * (conv(x) + b - mean) / sqrt(var + eps) + beta
    scale = gamma / jnp.sqrt(running_var + eps)                       # (Cout,)
    w_hwio = jnp.transpose(weight, (2, 3, 1, 0)) * scale[None, None, None, :]  # (3,3,Cin,Cout)
    b_fused = (scale * (bias - running_mean) + beta).reshape(1, Cout).astype(jnp.float32)

    # ---- Sub-pixel (phase) decomposition of "3x3 conv on x2 nearest upsample" ------------
    # Output pixel (2i+a, 2j+b) only touches original pixels (i+a+r-1, j+b+s-1), r,s in {0,1}.
    # w_phase[a, b, r, s] accumulates the 3x3 taps (ky, kx) that land on that original pixel.
    w_phase = jnp.zeros((2, 2, 2, 2, Cin, Cout), w_hwio.dtype)
    for a in range(2):
        for b in range(2):
            for ky in range(3):
                r = (a + ky - 1) // 2 + 1 - a          # in {0, 1}
                for kx in range(3):
                    s = (b + kx - 1) // 2 + 1 - b      # in {0, 1}
                    w_phase = w_phase.at[a, b, r, s].add(w_hwio[ky, kx])
    w_phase = w_phase.reshape(2, 2, 4 * Cin, Cout)     # K ordered (r, s, ci)

    # ---- Small input prep (single cheap pass over the ORIGINAL-resolution tensor) --------
    x_nhwc = jnp.transpose(x_nchw, (0, 2, 3, 1))                       # (N, H, W, Cin)
    x_pad = jnp.pad(x_nhwc, ((0, 0), (1, 1), (1, 1), (0, 0)))          # (N, H+2, W+2, Cin)

    # ---- Pallas call: grid over (batch, row-phase), both parallel -------------------------
    out6 = pl.pallas_call(
        up_conv_kernel,
        out_shape=jax.ShapeDtypeStruct((N, 2, 2, H, W, Cout), x_nchw.dtype),
        grid=(N, 2),
        in_specs=[
            pl.BlockSpec((1, H + 2, W + 2, Cin), lambda n, a: (n, 0, 0, 0)),
            pl.BlockSpec((1, 2, 4 * Cin, Cout), lambda n, a: (a, 0, 0, 0)),
            pl.BlockSpec((1, Cout), lambda n, a: (0, 0)),
        ],
        out_specs=pl.BlockSpec((1, 1, 2, H, W, Cout),
                               lambda n, a: (n, a, 0, 0, 0, 0)),
        scratch_shapes=[pltpu.VMEM((H, W, 4 * Cin), x_nchw.dtype)],
        compiler_params=pltpu.CompilerParams(
            dimension_semantics=("parallel", "parallel")),
    )(x_pad, w_phase, b_fused)

    # Phase interleave + NCHW: out[n, c, 2i+a, 2j+b] = out6[n, a, b, i, j, c].
    # Single fused XLA transpose/reshape pass over the output (removable if the consumer
    # accepts NHWC / phase-major layout).
    out = jnp.transpose(out6, (0, 5, 3, 1, 4, 2)).reshape(N, Cout, 2 * H, 2 * W)
    return out


if __name__ == "__main__":
    key = jax.random.PRNGKey(0)
    k_x, k_w, k_b = jax.random.split(key, 3)

    N, Cin, Cout, H, W = 2, 4, 8, 16, 16

    x = jax.random.normal(k_x, (N, Cin, H, W), jnp.float32)
    weight = jax.random.normal(k_w, (Cout, Cin, 3, 3), jnp.float32) * 0.1
    bias = jax.random.normal(k_b, (Cout,), jnp.float32) * 0.1
    # Deterministic, slightly non-trivial BN params (eval-mode semantics).
    gamma = 1.0 + 0.1 * jnp.arange(Cout, dtype=jnp.float32)
    beta = 0.05 * jnp.arange(Cout, dtype=jnp.float32)
    running_mean = 0.01 * jnp.arange(Cout, dtype=jnp.float32)
    running_var = jnp.ones((Cout,), jnp.float32)

    y = up_conv_forward(x, weight, bias, gamma, beta, running_mean, running_var)
    jax.block_until_ready(y)
    assert y.shape == (N, Cout, 2 * H, 2 * W), y.shape
    print("KERNEL_OK")
</pallas_src>

<mosaic_0001>
module attributes {stable_mosaic.version = 11 : i64} {
  func.func @up_conv_kernel(%arg0: i32, %arg1: i32, %arg2: memref<1x18x18x4xf32, #tpu.memory_space<vmem>>, %arg3: memref<1x2x16x8xf32, #tpu.memory_space<vmem>>, %arg4: memref<1x8xf32, #tpu.memory_space<vmem>>, %arg5: memref<1x1x2x16x16x8xf32, #tpu.memory_space<vmem>>, %arg6: memref<16x16x16xf32, #tpu.memory_space<vmem>>) attributes {dimension_semantics = [#tpu.dimension_semantics<parallel>, #tpu.dimension_semantics<parallel>], iteration_bounds = array<i64: 2, 2>, scalar_prefetch = 0 : i64, scratch_operands = 1 : i64, tpu.core_type = #tpu.core_type<tc>, window_params = [{transform_indices = @transform_0, window_bounds = array<i64: 1, 18, 18, 4>}, {transform_indices = @transform_1, window_bounds = array<i64: 1, 2, 16, 8>}, {pipeline_mode = #tpu.pipeline_mode<synchronous>, transform_indices = @transform_2, window_bounds = array<i64: 1, 8>}, {transform_indices = @transform_3, window_bounds = array<i64: 1, 1, 2, 16, 16, 8>}]} {
    %c0 = arith.constant 0 : index
    %c0_0 = arith.constant 0 : index
    %0 = vector.load %arg4[%c0, %c0_0] : memref<1x8xf32, #tpu.memory_space<vmem>>, vector<1x8xf32>
    %c0_i32 = arith.constant 0 : i32
    %1 = arith.addi %arg1, %c0_i32 : i32
    %c0_1 = arith.constant 0 : index
    %2 = arith.index_cast %1 : i32 to index
    %c0_2 = arith.constant 0 : index
    %c0_3 = arith.constant 0 : index
    %3 = vector.load %arg2[%c0_1, %2, %c0_2, %c0_3] : memref<1x18x18x4xf32, #tpu.memory_space<vmem>>, vector<1x16x16x4xf32>
    %4 = vector.shape_cast %3 : vector<1x16x16x4xf32> to vector<16x16x4xf32>
    %c0_4 = arith.constant 0 : index
    %c0_5 = arith.constant 0 : index
    %c0_6 = arith.constant 0 : index
    %5 = vector.load %arg6[%c0_4, %c0_5, %c0_6] : memref<16x16x16xf32, #tpu.memory_space<vmem>>, vector<16x16x4xf32>
    tpu.vector_store %arg6[%c0_4, %c0_5, %c0_6], %4 {strides = array<i32>} : memref<16x16x16xf32, #tpu.memory_space<vmem>>, vector<16x16x4xf32>,
    %c0_i32_7 = arith.constant 0 : i32
    %6 = arith.addi %arg1, %c0_i32_7 : i32
    %c0_8 = arith.constant 0 : index
    %7 = arith.index_cast %6 : i32 to index
    %c1 = arith.constant 1 : index
    %c0_9 = arith.constant 0 : index
    %8 = vector.load %arg2[%c0_8, %7, %c1, %c0_9] : memref<1x18x18x4xf32, #tpu.memory_space<vmem>>, vector<1x16x16x4xf32>
    %9 = vector.shape_cast %8 : vector<1x16x16x4xf32> to vector<16x16x4xf32>
    %c0_10 = arith.constant 0 : index
    %c0_11 = arith.constant 0 : index
    %c4 = arith.constant 4 : index
    %10 = vector.load %arg6[%c0_10, %c0_11, %c4] : memref<16x16x16xf32, #tpu.memory_space<vmem>>, vector<16x16x4xf32>
    tpu.vector_store %arg6[%c0_10, %c0_11, %c4], %9 {strides = array<i32>} : memref<16x16x16xf32, #tpu.memory_space<vmem>>, vector<16x16x4xf32>,
    %c1_i32 = arith.constant 1 : i32
    %11 = arith.addi %arg1, %c1_i32 : i32
    %c0_12 = arith.constant 0 : index
    %12 = arith.index_cast %11 : i32 to index
    %c0_13 = arith.constant 0 : index
    %c0_14 = arith.constant 0 : index
    %13 = vector.load %arg2[%c0_12, %12, %c0_13, %c0_14] : memref<1x18x18x4xf32, #tpu.memory_space<vmem>>, vector<1x16x16x4xf32>
    %14 = vector.shape_cast %13 : vector<1x16x16x4xf32> to vector<16x16x4xf32>
    %c0_15 = arith.constant 0 : index
    %c0_16 = arith.constant 0 : index
    %c8 = arith.constant 8 : index
    %15 = vector.load %arg6[%c0_15, %c0_16, %c8] : memref<16x16x16xf32, #tpu.memory_space<vmem>>, vector<16x16x4xf32>
    tpu.vector_store %arg6[%c0_15, %c0_16, %c8], %14 {strides = array<i32>} : memref<16x16x16xf32, #tpu.memory_space<vmem>>, vector<16x16x4xf32>,
    %c1_i32_17 = arith.constant 1 : i32
    %16 = arith.addi %arg1, %c1_i32_17 : i32
    %c0_18 = arith.constant 0 : index
    %17 = arith.index_cast %16 : i32 to index
    %c1_19 = arith.constant 1 : index
    %c0_20 = arith.constant 0 : index
    %18 = vector.load %arg2[%c0_18, %17, %c1_19, %c0_20] : memref<1x18x18x4xf32, #tpu.memory_space<vmem>>, vector<1x16x16x4xf32>
    %19 = vector.shape_cast %18 : vector<1x16x16x4xf32> to vector<16x16x4xf32>
    %c0_21 = arith.constant 0 : index
    %c0_22 = arith.constant 0 : index
    %c12 = arith.constant 12 : index
    %20 = vector.load %arg6[%c0_21, %c0_22, %c12] : memref<16x16x16xf32, #tpu.memory_space<vmem>>, vector<16x16x4xf32>
    tpu.vector_store %arg6[%c0_21, %c0_22, %c12], %19 {strides = array<i32>} : memref<16x16x16xf32, #tpu.memory_space<vmem>>, vector<16x16x4xf32>,
    %c0_23 = arith.constant 0 : index
    %c0_24 = arith.constant 0 : index
    %c0_25 = arith.constant 0 : index
    %21 = vector.load %arg6[%c0_23, %c0_24, %c0_25] : memref<16x16x16xf32, #tpu.memory_space<vmem>>, vector<16x16x16xf32>
    %22 = vector.shape_cast %21 : vector<16x16x16xf32> to vector<256x16xf32>
    %c0_26 = arith.constant 0 : index
    %c0_27 = arith.constant 0 : index
    %c0_28 = arith.constant 0 : index
    %c0_29 = arith.constant 0 : index
    %23 = vector.load %arg3[%c0_26, %c0_27, %c0_28, %c0_29] : memref<1x2x16x8xf32, #tpu.memory_space<vmem>>, vector<1x1x16x8xf32>
    %24 = vector.shape_cast %23 : vector<1x1x16x8xf32> to vector<16x8xf32>
    %cst = arith.constant dense<0.000000e+00> : vector<256x8xf32>
    %25 = tpu.matmul %22, %24, %cst {dimension_numbers = #tpu.dot_dimension_numbers<[1], [0], [0], [1], [0, 0, 1, 1], [], []>} : vector<256x16xf32>, vector<16x8xf32>, vector<256x8xf32> -> vector<256x8xf32>
    %26 = vector.broadcast %0 : vector<1x8xf32> to vector<256x8xf32>
    %27 = arith.addf %25, %26 : vector<256x8xf32>
    %cst_30 = arith.constant 0.000000e+00 : f32
    %28 = vector.broadcast %cst_30 : f32 to vector<256x8xf32>
    %29 = arith.cmpf ogt, %27, %28 : vector<256x8xf32>
    %cst_31 = arith.constant 0.00999999977 : f32
    %30 = vector.broadcast %cst_31 : f32 to vector<256x8xf32>
    %31 = arith.mulf %30, %27 : vector<256x8xf32>
    %32 = arith.select %29, %27, %31 : vector<256x8xi1>, vector<256x8xf32>
    %33 = vector.shape_cast %32 : vector<256x8xf32> to vector<16x16x8xf32>
    %c0_32 = arith.constant 0 : index
    %c0_33 = arith.constant 0 : index
    %c0_34 = arith.constant 0 : index
    %c0_35 = arith.constant 0 : index
    %c0_36 = arith.constant 0 : index
    %c0_37 = arith.constant 0 : index
    %34 = vector.load %arg5[%c0_32, %c0_33, %c0_34, %c0_35, %c0_36, %c0_37] : memref<1x1x2x16x16x8xf32, #tpu.memory_space<vmem>>, vector<1x1x1x16x16x8xf32>
    %35 = vector.shape_cast %34 : vector<1x1x1x16x16x8xf32> to vector<16x16x8xf32>
    %36 = vector.shape_cast %33 : vector<16x16x8xf32> to vector<1x1x1x16x16x8xf32>
    tpu.vector_store %arg5[%c0_32, %c0_33, %c0_34, %c0_35, %c0_36, %c0_37], %36 {strides = array<i32>} : memref<1x1x2x16x16x8xf32, #tpu.memory_space<vmem>>, vector<1x1x1x16x16x8xf32>,
    %c0_i32_38 = arith.constant 0 : i32
    %37 = arith.addi %arg1, %c0_i32_38 : i32
    %c0_39 = arith.constant 0 : index
    %38 = arith.index_cast %37 : i32 to index
    %c1_40 = arith.constant 1 : index
    %c0_41 = arith.constant 0 : index
    %39 = vector.load %arg2[%c0_39, %38, %c1_40, %c0_41] : memref<1x18x18x4xf32, #tpu.memory_space<vmem>>, vector<1x16x16x4xf32>
    %40 = vector.shape_cast %39 : vector<1x16x16x4xf32> to vector<16x16x4xf32>
    %c0_42 = arith.constant 0 : index
    %c0_43 = arith.constant 0 : index
    %c0_44 = arith.constant 0 : index
    %41 = vector.load %arg6[%c0_42, %c0_43, %c0_44] : memref<16x16x16xf32, #tpu.memory_space<vmem>>, vector<16x16x4xf32>
    tpu.vector_store %arg6[%c0_42, %c0_43, %c0_44], %40 {strides = array<i32>} : memref<16x16x16xf32, #tpu.memory_space<vmem>>, vector<16x16x4xf32>,
    %c0_i32_45 = arith.constant 0 : i32
    %42 = arith.addi %arg1, %c0_i32_45 : i32
    %c0_46 = arith.constant 0 : index
    %43 = arith.index_cast %42 : i32 to index
    %c2 = arith.constant 2 : index
    %c0_47 = arith.constant 0 : index
    %44 = vector.load %arg2[%c0_46, %43, %c2, %c0_47] : memref<1x18x18x4xf32, #tpu.memory_space<vmem>>, vector<1x16x16x4xf32>
    %45 = vector.shape_cast %44 : vector<1x16x16x4xf32> to vector<16x16x4xf32>
    %c0_48 = arith.constant 0 : index
    %c0_49 = arith.constant 0 : index
    %c4_50 = arith.constant 4 : index
    %46 = vector.load %arg6[%c0_48, %c0_49, %c4_50] : memref<16x16x16xf32, #tpu.memory_space<vmem>>, vector<16x16x4xf32>
    tpu.vector_store %arg6[%c0_48, %c0_49, %c4_50], %45 {strides = array<i32>} : memref<16x16x16xf32, #tpu.memory_space<vmem>>, vector<16x16x4xf32>,
    %c1_i32_51 = arith.constant 1 : i32
    %47 = arith.addi %arg1, %c1_i32_51 : i32
    %c0_52 = arith.constant 0 : index
    %48 = arith.index_cast %47 : i32 to index
    %c1_53 = arith.constant 1 : index
    %c0_54 = arith.constant 0 : index
    %49 = vector.load %arg2[%c0_52, %48, %c1_53, %c0_54] : memref<1x18x18x4xf32, #tpu.memory_space<vmem>>, vector<1x16x16x4xf32>
    %50 = vector.shape_cast %49 : vector<1x16x16x4xf32> to vector<16x16x4xf32>
    %c0_55 = arith.constant 0 : index
    %c0_56 = arith.constant 0 : index
    %c8_57 = arith.constant 8 : index
    %51 = vector.load %arg6[%c0_55, %c0_56, %c8_57] : memref<16x16x16xf32, #tpu.memory_space<vmem>>, vector<16x16x4xf32>
    tpu.vector_store %arg6[%c0_55, %c0_56, %c8_57], %50 {strides = array<i32>} : memref<16x16x16xf32, #tpu.memory_space<vmem>>, vector<16x16x4xf32>,
    %c1_i32_58 = arith.constant 1 : i32
    %52 = arith.addi %arg1, %c1_i32_58 : i32
    %c0_59 = arith.constant 0 : index
    %53 = arith.index_cast %52 : i32 to index
    %c2_60 = arith.constant 2 : index
    %c0_61 = arith.constant 0 : index
    %54 = vector.load %arg2[%c0_59, %53, %c2_60, %c0_61] : memref<1x18x18x4xf32, #tpu.memory_space<vmem>>, vector<1x16x16x4xf32>
    %55 = vector.shape_cast %54 : vector<1x16x16x4xf32> to vector<16x16x4xf32>
    %c0_62 = arith.constant 0 : index
    %c0_63 = arith.constant 0 : index
    %c12_64 = arith.constant 12 : index
    %56 = vector.load %arg6[%c0_62, %c0_63, %c12_64] : memref<16x16x16xf32, #tpu.memory_space<vmem>>, vector<16x16x4xf32>
    tpu.vector_store %arg6[%c0_62, %c0_63, %c12_64], %55 {strides = array<i32>} : memref<16x16x16xf32, #tpu.memory_space<vmem>>, vector<16x16x4xf32>,
    %c0_65 = arith.constant 0 : index
    %c0_66 = arith.constant 0 : index
    %c0_67 = arith.constant 0 : index
    %57 = vector.load %arg6[%c0_65, %c0_66, %c0_67] : memref<16x16x16xf32, #tpu.memory_space<vmem>>, vector<16x16x16xf32>
    %58 = vector.shape_cast %57 : vector<16x16x16xf32> to vector<256x16xf32>
    %c0_68 = arith.constant 0 : index
    %c1_69 = arith.constant 1 : index
    %c0_70 = arith.constant 0 : index
    %c0_71 = arith.constant 0 : index
    %59 = vector.load %arg3[%c0_68, %c1_69, %c0_70, %c0_71] : memref<1x2x16x8xf32, #tpu.memory_space<vmem>>, vector<1x1x16x8xf32>
    %60 = vector.shape_cast %59 : vector<1x1x16x8xf32> to vector<16x8xf32>
    %cst_72 = arith.constant dense<0.000000e+00> : vector<256x8xf32>
    %61 = tpu.matmul %58, %60, %cst_72 {dimension_numbers = #tpu.dot_dimension_numbers<[1], [0], [0], [1], [0, 0, 1, 1], [], []>} : vector<256x16xf32>, vector<16x8xf32>, vector<256x8xf32> -> vector<256x8xf32>
    %62 = vector.broadcast %0 : vector<1x8xf32> to vector<256x8xf32>
    %63 = arith.addf %61, %62 : vector<256x8xf32>
    %cst_73 = arith.constant 0.000000e+00 : f32
    %64 = vector.broadcast %cst_73 : f32 to vector<256x8xf32>
    %65 = arith.cmpf ogt, %63, %64 : vector<256x8xf32>
    %cst_74 = arith.constant 0.00999999977 : f32
    %66 = vector.broadcast %cst_74 : f32 to vector<256x8xf32>
    %67 = arith.mulf %66, %63 : vector<256x8xf32>
    %68 = arith.select %65, %63, %67 : vector<256x8xi1>, vector<256x8xf32>
    %69 = vector.shape_cast %68 : vector<256x8xf32> to vector<16x16x8xf32>
    %c0_75 = arith.constant 0 : index
    %c0_76 = arith.constant 0 : index
    %c1_77 = arith.constant 1 : index
    %c0_78 = arith.constant 0 : index
    %c0_79 = arith.constant 0 : index
    %c0_80 = arith.constant 0 : index
    %70 = vector.load %arg5[%c0_75, %c0_76, %c1_77, %c0_78, %c0_79, %c0_80] : memref<1x1x2x16x16x8xf32, #tpu.memory_space<vmem>>, vector<1x1x1x16x16x8xf32>
    %71 = vector.shape_cast %70 : vector<1x1x1x16x16x8xf32> to vector<16x16x8xf32>
    %72 = vector.shape_cast %69 : vector<16x16x8xf32> to vector<1x1x1x16x16x8xf32>
    tpu.vector_store %arg5[%c0_75, %c0_76, %c1_77, %c0_78, %c0_79, %c0_80], %72 {strides = array<i32>} : memref<1x1x2x16x16x8xf32, #tpu.memory_space<vmem>>, vector<1x1x1x16x16x8xf32>,
    return
  }
  func.func @transform_0(%arg0: i32, %arg1: i32) -> (i32, i32, i32, i32) {
    %c0_i32 = arith.constant 0 : i32
    %c0_i32_0 = arith.constant 0 : i32
    %c0_i32_1 = arith.constant 0 : i32
    %c0_i32_2 = arith.constant 0 : i32
    return %arg0, %c0_i32, %c0_i32_0, %c0_i32_1 : i32, i32, i32, i32
  }
  func.func @transform_1(%arg0: i32, %arg1: i32) -> (i32, i32, i32, i32) {
    %c0_i32 = arith.constant 0 : i32
    %c0_i32_0 = arith.constant 0 : i32
    %c0_i32_1 = arith.constant 0 : i32
    %c0_i32_2 = arith.constant 0 : i32
    return %arg1, %c0_i32, %c0_i32_0, %c0_i32_1 : i32, i32, i32, i32
  }
  func.func @transform_2(%arg0: i32, %arg1: i32) -> (i32, i32) {
    %c0_i32 = arith.constant 0 : i32
    %c0_i32_0 = arith.constant 0 : i32
    %c0_i32_1 = arith.constant 0 : i32
    return %c0_i32, %c0_i32_0 : i32, i32
  }
  func.func @transform_3(%arg0: i32, %arg1: i32) -> (i32, i32, i32, i32, i32, i32) {
    %c0_i32 = arith.constant 0 : i32
    %c0_i32_0 = arith.constant 0 : i32
    %c0_i32_1 = arith.constant 0 : i32
    %c0_i32_2 = arith.constant 0 : i32
    %c0_i32_3 = arith.constant 0 : i32
    return %arg0, %arg1, %c0_i32, %c0_i32_0, %c0_i32_1, %c0_i32_2 : i32, i32, i32, i32, i32, i32
  }
}

</mosaic_0001>

<bundles_post_ra>
// kernel: tpu_custom_call.1
= control target key start
LH: loop header
LB: loop body
LE: loop exit
PB: predicated region body
PF: predicated region fallthrough
CT: control target
= control target key end

     0   :  { %s2708_s12 = smov 0   ;;  %s2710_s13 = smov 0   ;;  %s3900_s0 = inlined_call_operand.vmem [shape: f32[2,18,18,4], index: 0, kind: input, shape index: {}]   ;;  %s3901_s1 = inlined_call_operand.vmem [shape: f32[2,2,16,8], index: 1, kind: input, shape index: {}]   ;;  %s3902_s2 = inlined_call_operand.vmem [shape: f32[1,8], index: 2, kind: input, shape index: {}]   ;;  %s3903_s3 = inlined_call_operand.vmem [shape: f32[2,2,2,16,16,8], index: 3, kind: output, shape index: {}]  }
   0x1   :  { %s2712_s14 = smov 0   ;;  %s2714_s15 = smov 0  }
   0x2   :  { %s2716_s16 = smov 0  }
   0x3 LB: > { %s22_s17 = sadd.s32 1, %s2675_s14  ;;  %s25_s18 = sadd.s32 1, %s2679_s15  ;;  %s2683_s16 = sphi %s2716_s16, %s13_s16   ;;  %s2679_s15 = sphi %s2714_s15, %s3907_s15   ;;  %s2675_s14 = sphi %s2712_s14, %s3906_s14   ;;  %s2671_s13 = sphi %s2710_s13, %s3905_s13   ;;  %s2667_s12 = sphi %s2708_s12, %s3904_s12  }
   0x4   : > { %p23_p0 = scmp.ge.s32.totalorder %s22_s17, 2  ;;  %p2359_p1 = scmp.ge.s32.totalorder %s2683_s16, 1 }
   0x5   : > { %p161_p2 = scmp.lt.s32.totalorder %s2683_s16, 5 }
   0x6   : > { %s3909_s17 = smov (%p23_p0, %s22_s17), 0  ;;  %s3911_s18 = smov (!%p23_p0, %s25_s18), %s2679_s15 }
   0x7   : > { %p162_p3 = pnand %p2359_p1, %p161_p2  ;;  %p27_p4 = scmp.ge.s32.totalorder %s3911_s18, 2 }
   0x8   : > { %p194_p5 = scmp.lt.s32.totalorder (!%p162_p3), %s2671_s13, 1  ;;  %s214_s19 = smul.u32 (!%p162_p3), 24, %s2667_s12 }
   0x9   : > { %s3913_s18 = smov (%p27_p4, %s3911_s18), 0  ;;  %165 = sbr.rel (%p162_p3) target bundleno = 782 (0x30e), region = 32 }
   0xa   : > { %s2685_s25 = smov (!%p162_p3), 4   ;;  %s2686_s26 = smov (!%p162_p3), 8  }
   0xb   : > { %s2687_s27 = smov (!%p162_p3), 12   ;;  %p199_p6 = scmp.lt.s32.totalorder (!%p162_p3), %s2667_s12, 1 }
   0xe   : > { %s3915_s13 = smov (!%p194_p5, %s2671_s13), 1  ;;  %vm248_vm0 = vcmask 31744   ;;  %vm441_vm1 = vcmask 64544   ;;  %vm637_vm2 = vcmask 97344   ;;  %s3917_s12 = smov (!%p199_p6, %s2667_s12), 1  ;;  %vm830_vm3 = vcmask 130144  }
   0xf   : > { %s2599_s20 = smul.u32 432, %s3915_s13  ;;  %s2594_s28 = sshll.u32 %s3917_s12, 5  ;;  %vm900_vm4 = vcmask 130048   ;;  %vm1206_vm6 = vcmask 64512  }
  0x10   : > { %s3114_s4 = scalar_lea.vmem %s3901_s1, %s2594_s28  ;;  %s2363_s5 = sshll.u32 %s3917_s12, 6 }
  0x11   : > { %s198_s23 = scalar_lea.vmem %s3900_s0, %s2599_s20  ;;  %s2364_s6 = sshll.u32 %s3915_s13, 7 }
  0x12   : > { %s2747_s24 = scalar_lea.vmem %s198_s23, %s214_s19  ;;  %s210_s7 = sadd.s32 %s2364_s6, %s2363_s5 }
  0x13   : > { %v2750_v0 = vld [vmem:[%s2747_s24 + $0x19] sm:$0xff]  ;;  %v281_v1 = vld [vmem:[%s2747_s24 + $0x1] sm:$0xff]  ;;  %v2757_v2 = vld [vmem:[%s2747_s24 + $0x31] sm:$0xff]  ;;  %s2365_s10 = sshll.u32 %s210_s7, 3 }
  0x14   : > { %349 = vrot.lane.b32.xlu1 %v2750_v0, %s2685_s25  ;;  %345 = vrot.lane.b32.xlu0 %v281_v1, %s2685_s25  ;;  %v2762_v3 = vld [vmem:[%s2747_s24 + $0x21] sm:$0xff]  ;;  %v282_v4 = vld [vmem:[%s2747_s24 + $0x9] sm:$0xff]  ;;  %s3423_s13 = scalar_lea.vmem %s3903_s3, %s2365_s10 }
  0x15   : > { %353 = vrot.lane.b32.xlu2 %v2757_v2, %s2685_s25  ;;  %v2766_v5 = vld [vmem:[%s2747_s24 + $0x39] sm:$0xff]  ;;  %v2774_v6 = vld [vmem:[%s2747_s24 + $0x51] sm:$0xff]  ;;  %v2777_v7 = vld [vmem:[%s2747_s24 + $0x49] sm:$0xff] }
  0x16   : > { %v2780_v8 = vld [vmem:[%s2747_s24 + $0x61] sm:$0xff]  ;;  %v2789_v9 = vld [vmem:[%s2747_s24 + $0x79] sm:$0xff]  ;;  %v2792_v10 = vld [vmem:[%s2747_s24 + $0x69] sm:$0xff] }
  0x17   : > { %v2795_v11 = vld [vmem:[%s2747_s24 + $0x81] sm:$0xff]  ;;  %v2804_v12 = vld [vmem:[%s2747_s24 + $0x99] sm:$0xff]  ;;  %v2807_v13 = vld [vmem:[%s2747_s24 + $0x91] sm:$0xff] }
  0x18   : > { %v2810_v14 = vld [vmem:[%s2747_s24 + $0xa9] sm:$0xff]  ;;  %v2819_v15 = vld [vmem:[%s2747_s24 + $0xc1] sm:$0xff]  ;;  %v2822_v16 = vld [vmem:[%s2747_s24 + $0xb1] sm:$0xff] }
  0x19   : > { %v2825_v17 = vld [vmem:[%s2747_s24 + $0xc9] sm:$0xff]  ;;  %v2834_v18 = vld [vmem:[%s2747_s24 + $0xe1] sm:$0xff]  ;;  %v2837_v19 = vld [vmem:[%s2747_s24 + $0xd9] sm:$0xff] }
  0x1a   : > { %v2840_v20 = vld [vmem:[%s2747_s24 + $0xf1] sm:$0xff]  ;;  %v2849_v21 = vld [vmem:[%s2747_s24 + $0x109] sm:$0xff]  ;;  %v2852_v22 = vld [vmem:[%s2747_s24 + $0xf9] sm:$0xff] }
  0x1b   : > { %v2855_v23 = vld [vmem:[%s2747_s24 + $0x111] sm:$0xff]  ;;  %v2864_v24 = vld [vmem:[%s2747_s24 + $0x129] sm:$0xff]  ;;  %v2867_v25 = vld [vmem:[%s2747_s24 + $0x121] sm:$0xff] }
  0x1c   : > { %351 = vrot.lane.b32.xlu1 %v2762_v3, %s2685_s25  ;;  %347 = vrot.lane.b32.xlu0 %v282_v4, %s2685_s25  ;;  %v2870_v26 = vld [vmem:[%s2747_s24 + $0x139] sm:$0xff]  ;;  %v309_v27 = vld [vmem:[%s2747_s24 + $0x151] sm:$0xff] }
  0x1d   : > { %355 = vrot.lane.b32.xlu2 %v2766_v5, %s2685_s25  ;;  %v2880_v28 = vld [vmem:[%s2747_s24 + $0x141] sm:$0xff]  ;;  %v310_v29 = vld [vmem:[%s2747_s24 + $0x159] sm:$0xff]  ;;  %v312_v30 = vld [vmem:[%s2747_s24 + $0x171] sm:$0xff] }
  0x1e   : > { %v311_v31 = vld [vmem:[%s2747_s24 + $0x169] sm:$0xff]  ;;  %v2366_v32 = vld [vmem:[%s2747_s24 + $0x18] sm:$0xff]  ;;  %v216_v34 = vld [vmem:[%s2747_s24] sm:$0xff] }
  0x1f   : > { %v2368_v33 = vld [vmem:[%s2747_s24 + $0x30] sm:$0xff]  ;;  %251 = vst.msk [vmem:[#allocation2 + $0x10] sm:$0xff] %vm248_vm0, %v2366_v32  ;;  %v2369_v35 = vld [vmem:[%s2747_s24 + $0x38] sm:$0xff]  ;;  %v2367_v36 = vld [vmem:[%s2747_s24 + $0x20] sm:$0xff] }
  0x20   : > { %253 = vst.msk [vmem:[#allocation2 + $0x20] sm:$0xff] %vm248_vm0, %v2368_v33  ;;  %v2372_v37 = vld [vmem:[%s2747_s24 + $0x60] sm:$0xff]  ;;  %v2371_v38 = vld [vmem:[%s2747_s24 + $0x50] sm:$0xff]  ;;  %v2370_v39 = vld [vmem:[%s2747_s24 + $0x48] sm:$0xff] }
  0x21   : > { %249 = vst.msk [vmem:[#allocation2] sm:$0xff] %vm248_vm0, %v216_v34  ;;  %v2374_v40 = vld [vmem:[%s2747_s24 + $0x78] sm:$0xff]  ;;  %v2373_v41 = vld [vmem:[%s2747_s24 + $0x68] sm:$0xff]  ;;  %v2375_v45 = vld [vmem:[%s2747_s24 + $0x80] sm:$0xff] }
  0x22   : > { %254 = vst.msk [vmem:[#allocation2 + $0x28] sm:$0xff] %vm248_vm0, %v2369_v35  ;;  %v217_v42 = vld [vmem:[%s2747_s24 + $0x8] sm:$0xff]  ;;  %v2377_v43 = vld [vmem:[%s2747_s24 + $0x98] sm:$0xff]  ;;  %v2376_v46 = vld [vmem:[%s2747_s24 + $0x90] sm:$0xff] }
  0x23   : > { %252 = vst.msk [vmem:[#allocation2 + $0x18] sm:$0xff] %vm248_vm0, %v2367_v36  ;;  %v2380_v47 = vld [vmem:[%s2747_s24 + $0xc0] sm:$0xff]  ;;  %v2379_v48 = vld [vmem:[%s2747_s24 + $0xb0] sm:$0xff]  ;;  %v2382_v50 = vld [vmem:[%s2747_s24 + $0xd8] sm:$0xff] }
  0x24   : > { %359 = vrot.lane.b32.xlu1 %v2774_v6, %s2685_s25  ;;  %357 = vrot.lane.b32.xlu0 %v2777_v7, %s2685_s25  ;;  %257 = vst.msk [vmem:[#allocation2 + $0x40] sm:$0xff] %vm248_vm0, %v2372_v37  ;;  %v2383_v49 = vld [vmem:[%s2747_s24 + $0xe0] sm:$0xff]  ;;  %v2378_v52 = vld [vmem:[%s2747_s24 + $0xa8] sm:$0xff] }
  0x25   : > { %361 = vrot.lane.b32.xlu2 %v2780_v8, %s2685_s25  ;;  %256 = vst.msk [vmem:[#allocation2 + $0x38] sm:$0xff] %vm248_vm0, %v2371_v38  ;;  %v2386_v53 = vld [vmem:[%s2747_s24 + $0x108] sm:$0xff]  ;;  %v2385_v54 = vld [vmem:[%s2747_s24 + $0xf8] sm:$0xff]  ;;  %v2388_v58 = vld [vmem:[%s2747_s24 + $0x120] sm:$0xff] }
  0x26   : > { %255 = vst.msk [vmem:[#allocation2 + $0x30] sm:$0xff] %vm248_vm0, %v2370_v39  ;;  %v2381_v56 = vld [vmem:[%s2747_s24 + $0xc8] sm:$0xff]  ;;  %v2384_v62 = vld [vmem:[%s2747_s24 + $0xf0] sm:$0xff]  ;;  %v2391_v1 = vld [vmem:[%s2747_s24 + $0x140] sm:$0xff] }
  0x27   : > { %259 = vst.msk [vmem:[#allocation2 + $0x50] sm:$0xff] %vm248_vm0, %v2374_v40  ;;  %v2389_v57 = vld [vmem:[%s2747_s24 + $0x128] sm:$0xff]  ;;  %v2392_v63 = vld [vmem:[%s2747_s24 + $0x150] sm:$0xff] }
  0x28   : > { %258 = vst.msk [vmem:[#allocation2 + $0x48] sm:$0xff] %vm248_vm0, %v2373_v41 }
  0x29   : > { %250 = vst.msk [vmem:[#allocation2 + $0x8] sm:$0xff] %vm248_vm0, %v217_v42 }
  0x2a   : > { %262 = vst.msk [vmem:[#allocation2 + $0x68] sm:$0xff] %vm248_vm0, %v2377_v43 }
  0x2b   : > { %260 = vst.msk [vmem:[#allocation2 + $0x58] sm:$0xff] %vm248_vm0, %v2375_v45 }
  0x2c   : > { %365 = vrot.lane.b32.xlu1 %v2789_v9, %s2685_s25  ;;  %363 = vrot.lane.b32.xlu0 %v2792_v10, %s2685_s25  ;;  %261 = vst.msk [vmem:[#allocation2 + $0x60] sm:$0xff] %vm248_vm0, %v2376_v46 }
  0x2d   : > { %367 = vrot.lane.b32.xlu2 %v2795_v11, %s2685_s25  ;;  %265 = vst.msk [vmem:[#allocation2 + $0x80] sm:$0xff] %vm248_vm0, %v2380_v47 }
  0x2e   : > { %264 = vst.msk [vmem:[#allocation2 + $0x78] sm:$0xff] %vm248_vm0, %v2379_v48 }
  0x2f   : > { %268 = vst.msk [vmem:[#allocation2 + $0x98] sm:$0xff] %vm248_vm0, %v2383_v49 }
  0x30   : > { %267 = vst.msk [vmem:[#allocation2 + $0x90] sm:$0xff] %vm248_vm0, %v2382_v50 }
  0x31   : > { %263 = vst.msk [vmem:[#allocation2 + $0x70] sm:$0xff] %vm248_vm0, %v2378_v52 }
  0x32   : > { %271 = vst.msk [vmem:[#allocation2 + $0xb0] sm:$0xff] %vm248_vm0, %v2386_v53 }
  0x33   : > { %270 = vst.msk [vmem:[#allocation2 + $0xa8] sm:$0xff] %vm248_vm0, %v2385_v54 }
  0x34   : > { %371 = vrot.lane.b32.xlu1 %v2804_v12, %s2685_s25  ;;  %369 = vrot.lane.b32.xlu0 %v2807_v13, %s2685_s25  ;;  %266 = vst.msk [vmem:[#allocation2 + $0x88] sm:$0xff] %vm248_vm0, %v2381_v56 }
  0x35   : > { %373 = vrot.lane.b32.xlu2 %v2810_v14, %s2685_s25  ;;  %274 = vst.msk [vmem:[#allocation2 + $0xc8] sm:$0xff] %vm248_vm0, %v2389_v57 }
  0x36   : > { %273 = vst.msk [vmem:[#allocation2 + $0xc0] sm:$0xff] %vm248_vm0, %v2388_v58 }
  0x37   : > { %269 = vst.msk [vmem:[#allocation2 + $0xa0] sm:$0xff] %vm248_vm0, %v2384_v62 }
  0x38   : > { %277 = vst.msk [vmem:[#allocation2 + $0xe0] sm:$0xff] %vm248_vm0, %v2392_v63 }
  0x39   : > { %276 = vst.msk [vmem:[#allocation2 + $0xd8] sm:$0xff] %vm248_vm0, %v2391_v1 }
  0x3c   : > { %377 = vrot.lane.b32.xlu1 %v2819_v15, %s2685_s25  ;;  %375 = vrot.lane.b32.xlu0 %v2822_v16, %s2685_s25 }
  0x3d   : > { %379 = vrot.lane.b32.xlu2 %v2825_v17, %s2685_s25 }
  0x44   : > { %383 = vrot.lane.b32.xlu1 %v2834_v18, %s2685_s25  ;;  %381 = vrot.lane.b32.xlu0 %v2837_v19, %s2685_s25 }
  0x45   : > { %385 = vrot.lane.b32.xlu2 %v2840_v20, %s2685_s25 }
  0x4c   : > { %389 = vrot.lane.b32.xlu1 %v2849_v21, %s2685_s25  ;;  %387 = vrot.lane.b32.xlu0 %v2852_v22, %s2685_s25 }
  0x4d   : > { %391 = vrot.lane.b32.xlu2 %v2855_v23, %s2685_s25 }
  0x54   : > { %395 = vrot.lane.b32.xlu1 %v2864_v24, %s2685_s25  ;;  %393 = vrot.lane.b32.xlu0 %v2867_v25, %s2685_s25 }
  0x55   : > { %397 = vrot.lane.b32.xlu2 %v2870_v26, %s2685_s25 }
  0x5c   : > { %401 = vrot.lane.b32.xlu1 %v309_v27, %s2685_s25  ;;  %399 = vrot.lane.b32.xlu0 %v2880_v28, %s2685_s25 }
  0x5d   : > { %403 = vrot.lane.b32.xlu2 %v310_v29, %s2685_s25 }
  0x64   : > { %407 = vrot.lane.b32.xlu1 %v312_v30, %s2685_s25  ;;  %405 = vrot.lane.b32.xlu0 %v311_v31, %s2685_s25  ;;  %v2387_v30 = vld [vmem:[%s2747_s24 + $0x110] sm:$0xff] }
  0x65   : > { %541 = vrot.lane.b32.xlu2 %v2366_v32, %s2686_s26  ;;  %v2395_v31 = vld [vmem:[%s2747_s24 + $0x170] sm:$0xff]  ;;  %272 = vst.msk [vmem:[#allocation2 + $0xb8] sm:$0xff] %vm248_vm0, %v2387_v30  ;;  %v2394_v32 = vld [vmem:[%s2747_s24 + $0x168] sm:$0xff] }
  0x66   : > { %280 = vst.msk [vmem:[#allocation2 + $0xf8] sm:$0xff] %vm248_vm0, %v2395_v31 }
  0x67   : > { %279 = vst.msk [vmem:[#allocation2 + $0xf0] sm:$0xff] %vm248_vm0, %v2394_v32 }
  0x6c   : > { %545 = vrot.lane.b32.xlu1 %v2368_v33, %s2686_s26  ;;  %543 = vrot.lane.b32.xlu0 %v2367_v36, %s2686_s26  ;;  %v2390_v36 = vld [vmem:[%s2747_s24 + $0x138] sm:$0xff] }
  0x6d   : > { %547 = vrot.lane.b32.xlu2 %v2369_v35, %s2686_s26  ;;  %275 = vst.msk [vmem:[#allocation2 + $0xd0] sm:$0xff] %vm248_vm0, %v2390_v36 }
  0x6f   : > { %v354_v44 = vpop.permute.xlu2 %353 }
  0x70   : > { %446 = vst.msk [vmem:[#allocation2 + $0x20] sm:$0xff] %vm441_vm1, %v354_v44 }
  0x74   : > { %551 = vrot.lane.b32.xlu1 %v2371_v38, %s2686_s26  ;;  %549 = vrot.lane.b32.xlu0 %v2370_v39, %s2686_s26 }
  0x75   : > { %553 = vrot.lane.b32.xlu2 %v2372_v37, %s2686_s26 }
  0x77   : > { %v356_v51 = vpop.permute.xlu2 %355 }
  0x78   : > { %447 = vst.msk [vmem:[#allocation2 + $0x28] sm:$0xff] %vm441_vm1, %v356_v51  ;;  %v2397_v51 = vld [vmem:[%s2747_s24 + $0x188] sm:$0xff] }
  0x7c   : > { %557 = vrot.lane.b32.xlu1 %v2374_v40, %s2686_s26  ;;  %555 = vrot.lane.b32.xlu0 %v2373_v41, %s2686_s26  ;;  %v2393_v40 = vld [vmem:[%s2747_s24 + $0x158] sm:$0xff] }
  0x7d   : > { %559 = vrot.lane.b32.xlu2 %v2375_v45, %s2686_s26  ;;  %278 = vst.msk [vmem:[#allocation2 + $0xe8] sm:$0xff] %vm248_vm0, %v2393_v40 }
  0x7f   : > { %v362_v55 = vpop.permute.xlu2 %361 }
  0x80   : > { %450 = vst.msk [vmem:[#allocation2 + $0x40] sm:$0xff] %vm441_vm1, %v362_v55 }
  0x84   : > { %563 = vrot.lane.b32.xlu1 %v2377_v43, %s2686_s26  ;;  %561 = vrot.lane.b32.xlu0 %v2376_v46, %s2686_s26 }
  0x85   : > { %565 = vrot.lane.b32.xlu2 %v2378_v52, %s2686_s26 }
  0x86   : > { %v350_v59 = vpop.permute.xlu1 %349  ;;  %v346_v60 = vpop.permute.xlu0 %345 }
  0x87   : > { %444 = vst.msk [vmem:[#allocation2 + $0x10] sm:$0xff] %vm441_vm1, %v350_v59  ;;  %v368_v61 = vpop.permute.xlu2 %367 }
  0x88   : > { %442 = vst.msk [vmem:[#allocation2] sm:$0xff] %vm441_vm1, %v346_v60 }
  0x89   : > { %453 = vst.msk [vmem:[#allocation2 + $0x58] sm:$0xff] %vm441_vm1, %v368_v61 }
  0x8c   : > { %569 = vrot.lane.b32.xlu1 %v2380_v47, %s2686_s26  ;;  %567 = vrot.lane.b32.xlu0 %v2379_v48, %s2686_s26  ;;  %v2396_v47 = vld [vmem:[%s2747_s24 + $0x180] sm:$0xff] }
  0x8d   : > { %571 = vrot.lane.b32.xlu2 %v2381_v56, %s2686_s26 }
  0x8e   : > { %v352_v4 = vpop.permute.xlu1 %351  ;;  %v348_v27 = vpop.permute.xlu0 %347 }
  0x8f   : > { %445 = vst.msk [vmem:[#allocation2 + $0x18] sm:$0xff] %vm441_vm1, %v352_v4  ;;  %v374_v29 = vpop.permute.xlu2 %373 }
  0x90   : > { %443 = vst.msk [vmem:[#allocation2 + $0x8] sm:$0xff] %vm441_vm1, %v348_v27 }
  0x91   : > { %456 = vst.msk [vmem:[#allocation2 + $0x70] sm:$0xff] %vm441_vm1, %v374_v29 }
  0x94   : > { %575 = vrot.lane.b32.xlu1 %v2383_v49, %s2686_s26  ;;  %573 = vrot.lane.b32.xlu0 %v2382_v50, %s2686_s26 }
  0x95   : > { %577 = vrot.lane.b32.xlu2 %v2384_v62, %s2686_s26 }
  0x96   : > { %v360_v33 = vpop.permute.xlu1 %359  ;;  %v358_v34 = vpop.permute.xlu0 %357 }
  0x97   : > { %449 = vst.msk [vmem:[#allocation2 + $0x38] sm:$0xff] %vm441_vm1, %v360_v33  ;;  %v380_v35 = vpop.permute.xlu2 %379 }
  0x98   : > { %448 = vst.msk [vmem:[#allocation2 + $0x30] sm:$0xff] %vm441_vm1, %v358_v34 }
  0x99   : > { %459 = vst.msk [vmem:[#allocation2 + $0x88] sm:$0xff] %vm441_vm1, %v380_v35  ;;  %v1303_v35 = vld [vmem:[%s2747_s24 + $0x2] sm:$0xff] }
  0x9c   : > { %581 = vrot.lane.b32.xlu1 %v2386_v53, %s2686_s26  ;;  %579 = vrot.lane.b32.xlu0 %v2385_v54, %s2686_s26 }
  0x9d   : > { %583 = vrot.lane.b32.xlu2 %v2387_v30, %s2686_s26 }
  0x9e   : > { %v366_v37 = vpop.permute.xlu1 %365  ;;  %v364_v38 = vpop.permute.xlu0 %363 }
  0x9f   : > { %452 = vst.msk [vmem:[#allocation2 + $0x50] sm:$0xff] %vm441_vm1, %v366_v37  ;;  %v386_v39 = vpop.permute.xlu2 %385 }
  0xa0   : > { %451 = vst.msk [vmem:[#allocation2 + $0x48] sm:$0xff] %vm441_vm1, %v364_v38 }
  0xa1   : > { %462 = vst.msk [vmem:[#allocation2 + $0xa0] sm:$0xff] %vm441_vm1, %v386_v39  ;;  %v896_v39 = vld [vmem:[%s3114_s4 + $0x8] sm:$0xff] }
  0xa2   : > { %1011 = vmatpush.msra.mxu0 %v896_v39  ;;  %2595 = vmatpush.msra.mxu2 %v896_v39  ;;  %v3232_v39 = vld [vmem:[%s2747_s24 + $0xc9] sm:$0xff] }
  0xa4   : > { %587 = vrot.lane.b32.xlu1 %v2389_v57, %s2686_s26  ;;  %585 = vrot.lane.b32.xlu0 %v2388_v58, %s2686_s26 }
  0xa5   : > { %589 = vrot.lane.b32.xlu2 %v2390_v36, %s2686_s26 }
  0xa6   : > { %v372_v41 = vpop.permute.xlu1 %371  ;;  %v370_v42 = vpop.permute.xlu0 %369 }
  0xa7   : > { %455 = vst.msk [vmem:[#allocation2 + $0x68] sm:$0xff] %vm441_vm1, %v372_v41  ;;  %v392_v43 = vpop.permute.xlu2 %391  ;;  %v895_v41 = vld [vmem:[%s3114_s4] sm:$0xff] }
  0xa8   : > { %454 = vst.msk [vmem:[#allocation2 + $0x60] sm:$0xff] %vm441_vm1, %v370_v42  ;;  %1012 = vmatpush.msra.mxu0 %v895_v41  ;;  %2596 = vmatpush.msra.mxu2 %v895_v41  ;;  %v1257_v41 = vld [vmem:[%s2747_s24 + $0xd9] sm:$0xff] }
  0xa9   : > { %465 = vst.msk [vmem:[#allocation2 + $0xb8] sm:$0xff] %vm441_vm1, %v392_v43 }
  0xac   : > { %593 = vrot.lane.b32.xlu1 %v2392_v63, %s2686_s26  ;;  %591 = vrot.lane.b32.xlu0 %v2391_v1, %s2686_s26 }
  0xad   : > { %595 = vrot.lane.b32.xlu2 %v2393_v40, %s2686_s26  ;;  %v2511_v40 = vld [vmem:[%s2747_s24 + $0xe2] sm:$0xff] }
  0xae   : > { %v378_v44 = vpop.permute.xlu1 %377  ;;  %v376_v45 = vpop.permute.xlu0 %375 }
  0xaf   : > { %458 = vst.msk [vmem:[#allocation2 + $0x80] sm:$0xff] %vm441_vm1, %v378_v44  ;;  %v398_v46 = vpop.permute.xlu2 %397 }
  0xb0   : > { %457 = vst.msk [vmem:[#allocation2 + $0x78] sm:$0xff] %vm441_vm1, %v376_v45  ;;  %v1304_v45 = vld [vmem:[%s2747_s24 + $0xa] sm:$0xff] }
  0xb1   : > { %468 = vst.msk [vmem:[#allocation2 + $0xd0] sm:$0xff] %vm441_vm1, %v398_v46 }
  0xb4   : > { %599 = vrot.lane.b32.xlu1 %v2395_v31, %s2686_s26  ;;  %597 = vrot.lane.b32.xlu0 %v2394_v32, %s2686_s26  ;;  %v1319_v32 = vld [vmem:[%s2747_s24 + $0xc2] sm:$0xff] }
  0xb5   : > { %601 = vrot.lane.b32.xlu2 %v2396_v47, %s2686_s26 }
  0xb6   : > { %v384_v48 = vpop.permute.xlu1 %383  ;;  %v382_v49 = vpop.permute.xlu0 %381 }
  0xb7   : > { %461 = vst.msk [vmem:[#allocation2 + $0x98] sm:$0xff] %vm441_vm1, %v384_v48  ;;  %v404_v50 = vpop.permute.xlu2 %403  ;;  %v2495_v48 = vld [vmem:[%s2747_s24 + $0x22] sm:$0xff] }
  0xb8   : > { %460 = vst.msk [vmem:[#allocation2 + $0x90] sm:$0xff] %vm441_vm1, %v382_v49  ;;  %v2512_v49 = vld [vmem:[%s2747_s24 + $0xf2] sm:$0xff] }
  0xb9   : > { %471 = vst.msk [vmem:[#allocation2 + $0xe8] sm:$0xff] %vm441_vm1, %v404_v50 }
  0xbc   : > { %734 = vrot.lane.b32.xlu1 %v2750_v0, %s2687_s27  ;;  %603 = vrot.lane.b32.xlu0 %v2397_v51, %s2686_s26 }
  0xbd   : > { %736 = vrot.lane.b32.xlu2 %v2762_v3, %s2687_s27 }
  0xbe   : > { %v390_v52 = vpop.permute.xlu1 %389  ;;  %v388_v53 = vpop.permute.xlu0 %387 }
  0xbf   : > { %464 = vst.msk [vmem:[#allocation2 + $0xb0] sm:$0xff] %vm441_vm1, %v390_v52  ;;  %v542_v54 = vpop.permute.xlu2 %541 }
  0xc0   : > { %463 = vst.msk [vmem:[#allocation2 + $0xa8] sm:$0xff] %vm441_vm1, %v388_v53 }
  0xc1   : > { %638 = vst.msk [vmem:[#allocation2] sm:$0xff] %vm637_vm2, %v542_v54  ;;  %v2496_v54 = vld [vmem:[%s2747_s24 + $0x32] sm:$0xff] }
  0xc4   : > { %740 = vrot.lane.b32.xlu1 %v2766_v5, %s2687_s27  ;;  %738 = vrot.lane.b32.xlu0 %v2757_v2, %s2687_s27 }
  0xc5   : > { %742 = vrot.lane.b32.xlu2 %v2777_v7, %s2687_s27 }
  0xc6   : > { %v396_v55 = vpop.permute.xlu1 %395  ;;  %v394_v56 = vpop.permute.xlu0 %393 }
  0xc7   : > { %467 = vst.msk [vmem:[#allocation2 + $0xc8] sm:$0xff] %vm441_vm1, %v396_v55  ;;  %v548_v57 = vpop.permute.xlu2 %547  ;;  %v2513_v55 = vld [vmem:[%s2747_s24 + $0xfa] sm:$0xff] }
  0xc8   : > { %466 = vst.msk [vmem:[#allocation2 + $0xc0] sm:$0xff] %vm441_vm1, %v394_v56 }
  0xc9   : > { %641 = vst.msk [vmem:[#allocation2 + $0x18] sm:$0xff] %vm637_vm2, %v548_v57 }
  0xcc   : > { %746 = vrot.lane.b32.xlu1 %v2780_v8, %s2687_s27  ;;  %744 = vrot.lane.b32.xlu0 %v2774_v6, %s2687_s27 }
  0xcd   : > { %748 = vrot.lane.b32.xlu2 %v2792_v10, %s2687_s27 }
  0xce   : > { %v402_v58 = vpop.permute.xlu1 %401  ;;  %v400_v59 = vpop.permute.xlu0 %399 }
  0xcf   : > { %470 = vst.msk [vmem:[#allocation2 + $0xe0] sm:$0xff] %vm441_vm1, %v402_v58  ;;  %v554_v60 = vpop.permute.xlu2 %553 }
  0xd0   : > { %469 = vst.msk [vmem:[#allocation2 + $0xd8] sm:$0xff] %vm441_vm1, %v400_v59 }
  0xd1   : > { %644 = vst.msk [vmem:[#allocation2 + $0x30] sm:$0xff] %vm637_vm2, %v554_v60 }
  0xd4   : > { %752 = vrot.lane.b32.xlu1 %v2795_v11, %s2687_s27  ;;  %750 = vrot.lane.b32.xlu0 %v2789_v9, %s2687_s27 }
  0xd5   : > { %754 = vrot.lane.b32.xlu2 %v2807_v13, %s2687_s27 }
  0xd6   : > { %v408_v61 = vpop.permute.xlu1 %407  ;;  %v406_v62 = vpop.permute.xlu0 %405 }
  0xd7   : > { %473 = vst.msk [vmem:[#allocation2 + $0xf8] sm:$0xff] %vm441_vm1, %v408_v61  ;;  %v560_v10 = vpop.permute.xlu2 %559 }
  0xd8   : > { %472 = vst.msk [vmem:[#allocation2 + $0xf0] sm:$0xff] %vm441_vm1, %v406_v62  ;;  %v2497_v62 = vld [vmem:[%s2747_s24 + $0x3a] sm:$0xff] }
  0xd9   : > { %647 = vst.msk [vmem:[#allocation2 + $0x48] sm:$0xff] %vm637_vm2, %v560_v10  ;;  %v2514_v10 = vld [vmem:[%s2747_s24 + $0x10a] sm:$0xff] }
  0xdc   : > { %758 = vrot.lane.b32.xlu1 %v2810_v14, %s2687_s27  ;;  %756 = vrot.lane.b32.xlu0 %v2804_v12, %s2687_s27 }
  0xdd   : > { %760 = vrot.lane.b32.xlu2 %v2822_v16, %s2687_s27 }
  0xde   : > { %v546_v11 = vpop.permute.xlu1 %545  ;;  %v544_v9 = vpop.permute.xlu0 %543 }
  0xdf   : > { %640 = vst.msk [vmem:[#allocation2 + $0x10] sm:$0xff] %vm637_vm2, %v546_v11  ;;  %v566_v13 = vpop.permute.xlu2 %565 }
  0xe0   : > { %639 = vst.msk [vmem:[#allocation2 + $0x8] sm:$0xff] %vm637_vm2, %v544_v9 }
  0xe1   : > { %650 = vst.msk [vmem:[#allocation2 + $0x60] sm:$0xff] %vm637_vm2, %v566_v13 }
  0xe4   : > { %764 = vrot.lane.b32.xlu1 %v2825_v17, %s2687_s27  ;;  %762 = vrot.lane.b32.xlu0 %v2819_v15, %s2687_s27 }
  0xe5   : > { %766 = vrot.lane.b32.xlu2 %v2837_v19, %s2687_s27 }
  0xe6   : > { %v552_v14 = vpop.permute.xlu1 %551  ;;  %v550_v12 = vpop.permute.xlu0 %549 }
  0xe7   : > { %643 = vst.msk [vmem:[#allocation2 + $0x28] sm:$0xff] %vm637_vm2, %v552_v14  ;;  %v572_v16 = vpop.permute.xlu2 %571 }
  0xe8   : > { %642 = vst.msk [vmem:[#allocation2 + $0x20] sm:$0xff] %vm637_vm2, %v550_v12 }
  0xe9   : > { %653 = vst.msk [vmem:[#allocation2 + $0x78] sm:$0xff] %vm637_vm2, %v572_v16 }
  0xec   : > { %770 = vrot.lane.b32.xlu1 %v2840_v20, %s2687_s27  ;;  %768 = vrot.lane.b32.xlu0 %v2834_v18, %s2687_s27 }
  0xed   : > { %772 = vrot.lane.b32.xlu2 %v2852_v22, %s2687_s27 }
  0xee   : > { %v558_v17 = vpop.permute.xlu1 %557  ;;  %v556_v15 = vpop.permute.xlu0 %555 }
  0xef   : > { %646 = vst.msk [vmem:[#allocation2 + $0x40] sm:$0xff] %vm637_vm2, %v558_v17  ;;  %v578_v63 = vpop.permute.xlu2 %577 }
  0xf0   : > { %645 = vst.msk [vmem:[#allocation2 + $0x38] sm:$0xff] %vm637_vm2, %v556_v15  ;;  %v2498_v15 = vld [vmem:[%s2747_s24 + $0x4a] sm:$0xff] }
  0xf1   : > { %656 = vst.msk [vmem:[#allocation2 + $0x90] sm:$0xff] %vm637_vm2, %v578_v63 }
  0xf4   : > { %776 = vrot.lane.b32.xlu1 %v2855_v23, %s2687_s27  ;;  %774 = vrot.lane.b32.xlu0 %v2849_v21, %s2687_s27 }
  0xf5   : > { %778 = vrot.lane.b32.xlu2 %v2867_v25, %s2687_s27 }
  0xf6   : > { %v564_v1 = vpop.permute.xlu1 %563  ;;  %v562_v4 = vpop.permute.xlu0 %561 }
  0xf7   : > { %649 = vst.msk [vmem:[#allocation2 + $0x58] sm:$0xff] %vm637_vm2, %v564_v1  ;;  %v584_v27 = vpop.permute.xlu2 %583 }
  0xf8   : > { %648 = vst.msk [vmem:[#allocation2 + $0x50] sm:$0xff] %vm637_vm2, %v562_v4 }
  0xf9   : > { %659 = vst.msk [vmem:[#allocation2 + $0xa8] sm:$0xff] %vm637_vm2, %v584_v27  ;;  %v3201_v27 = vld [vmem:[%s2747_s24 + $0xc1] sm:$0xff] }
  0xfc   : > { %782 = vrot.lane.b32.xlu1 %v2870_v26, %s2687_s27  ;;  %780 = vrot.lane.b32.xlu0 %v2864_v24, %s2687_s27  ;;  %v2510_v26 = vld [vmem:[%s2747_s24 + $0xda] sm:$0xff] }
  0xfd   : > { %784 = vrot.lane.b32.xlu2 %v2880_v28, %s2687_s27 }
  0xfe   : > { %v570_v29 = vpop.permute.xlu1 %569  ;;  %v568_v30 = vpop.permute.xlu0 %567 }
  0xff   : > { %652 = vst.msk [vmem:[#allocation2 + $0x70] sm:$0xff] %vm637_vm2, %v570_v29  ;;  %v590_v31 = vpop.permute.xlu2 %589 }
 0x100   : > { %651 = vst.msk [vmem:[#allocation2 + $0x68] sm:$0xff] %vm637_vm2, %v568_v30 }
 0x101   : > { %662 = vst.msk [vmem:[#allocation2 + $0xc0] sm:$0xff] %vm637_vm2, %v590_v31  ;;  %v2527_v31 = vld [vmem:[%s3114_s4 + $0x18] sm:$0xff] }
 0x102   : > { %2597 = vmatpush.msra.mxu3 %v2527_v31  ;;  %2024 = vmatpush.msra.mxu1 %v2527_v31 }
 0x104   : > { %1591 = vrot.lane.b32.xlu1 %v2837_v19, %s2686_s26  ;;  %1399 = vrot.lane.b32.xlu0 %v1319_v32, %s2685_s25  ;;  %v1320_v19 = vld [vmem:[%s2747_s24 + $0xca] sm:$0xff] }
 0x105   : > { %1783 = vrot.lane.b32.xlu2 %v2510_v26, %s2687_s27 }
 0x106   : > { %v576_v33 = vpop.permute.xlu1 %575  ;;  %v574_v34 = vpop.permute.xlu0 %573 }
 0x107   : > { %655 = vst.msk [vmem:[#allocation2 + $0x88] sm:$0xff] %vm637_vm2, %v576_v33  ;;  %v596_v28 = vpop.permute.xlu2 %595 }
 0x108   : > { %654 = vst.msk [vmem:[#allocation2 + $0x80] sm:$0xff] %vm637_vm2, %v574_v34  ;;  %v1239_v34 = vld [vmem:[%s2747_s24 + $0x1] sm:$0xff] }
 0x109   : > { %665 = vst.msk [vmem:[#allocation2 + $0xd8] sm:$0xff] %vm637_vm2, %v596_v28  ;;  %v2526_v28 = vld [vmem:[%s3114_s4 + $0x10] sm:$0xff] }
 0x10a   : > { %2598 = vmatpush.msra.mxu3 %v2526_v28  ;;  %2025 = vmatpush.msra.mxu1 %v2526_v28 }
 0x10c   : > { %1559 = vrot.lane.b32.xlu1 %v2750_v0, %s2686_s26  ;;  %1367 = vrot.lane.b32.xlu0 %v1303_v35, %s2685_s25  ;;  %v2494_v0 = vld [vmem:[%s2747_s24 + $0x1a] sm:$0xff]  ;;  %v2499_v35 = vld [vmem:[%s2747_s24 + $0x52] sm:$0xff] }
 0x10d   : > { %1401 = vrot.lane.b32.xlu2 %v1320_v19, %s2685_s25  ;;  %v2516_v19 = vld [vmem:[%s2747_s24 + $0x122] sm:$0xff] }
 0x10e   : > { %v582_v36 = vpop.permute.xlu1 %581  ;;  %v580_v37 = vpop.permute.xlu0 %579 }
 0x10f   : > { %658 = vst.msk [vmem:[#allocation2 + $0xa0] sm:$0xff] %vm637_vm2, %v582_v36  ;;  %v602_v38 = vpop.permute.xlu2 %601 }
 0x110   : > { %657 = vst.msk [vmem:[#allocation2 + $0x98] sm:$0xff] %vm637_vm2, %v580_v37 }
 0x111   : > { %668 = vst.msk [vmem:[#allocation2 + $0xf0] sm:$0xff] %vm637_vm2, %v602_v38 }
 0x114   : > { %1593 = vrot.lane.b32.xlu1 %v2834_v18, %s2686_s26  ;;  %1751 = vrot.lane.b32.xlu0 %v2494_v0, %s2687_s27 }
 0x115   : > { %1785 = vrot.lane.b32.xlu2 %v2511_v40, %s2687_s27 }
 0x116   : > { %v588_v42 = vpop.permute.xlu1 %587  ;;  %v586_v43 = vpop.permute.xlu0 %585 }
 0x117   : > { %661 = vst.msk [vmem:[#allocation2 + $0xb8] sm:$0xff] %vm637_vm2, %v588_v42  ;;  %v737_v44 = vpop.permute.xlu2 %736 }
 0x118   : > { %660 = vst.msk [vmem:[#allocation2 + $0xb0] sm:$0xff] %vm637_vm2, %v586_v43 }
 0x119   : > { %832 = vst.msk [vmem:[#allocation2 + $0x8] sm:$0xff] %vm830_vm3, %v737_v44 }
 0x11c   : > { %1561 = vrot.lane.b32.xlu1 %v2762_v3, %s2686_s26  ;;  %1369 = vrot.lane.b32.xlu0 %v1304_v45, %s2685_s25  ;;  %v1240_v45 = vld [vmem:[%s2747_s24 + $0x9] sm:$0xff] }
 0x11d   : > { %1403 = vrot.lane.b32.xlu2 %v2510_v26, %s2685_s25 }
 0x11e   : > { %v594_v18 = vpop.permute.xlu1 %593  ;;  %v592_v46 = vpop.permute.xlu0 %591 }
 0x11f   : > { %664 = vst.msk [vmem:[#allocation2 + $0xd0] sm:$0xff] %vm637_vm2, %v594_v18  ;;  %v743_v47 = vpop.permute.xlu2 %742  ;;  %v2500_v18 = vld [vmem:[%s2747_s24 + $0x62] sm:$0xff] }
 0x120   : > { %663 = vst.msk [vmem:[#allocation2 + $0xc8] sm:$0xff] %vm637_vm2, %v592_v46  ;;  %v864_v60 = vld [vmem:[#allocation2 + $0x8] sm:$0xff] }
 0x121   : > { %835 = vst.msk [vmem:[#allocation2 + $0x20] sm:$0xff] %vm830_vm3, %v743_v47  ;;  %v3255_v46 = vld [vmem:[%s2747_s24 + $0x12a] sm:$0xff] }
 0x122   : > { %1272 = vst.msk [vmem:[#allocation2 + $0x8] sm:$0xff] %vm248_vm0, %v1240_v45 }
 0x124   : > { %1595 = vrot.lane.b32.xlu1 %v2840_v20, %s2686_s26  ;;  %1753 = vrot.lane.b32.xlu0 %v2495_v48, %s2687_s27 }
 0x125   : > { %1787 = vrot.lane.b32.xlu2 %v2512_v49, %s2687_s27 }
 0x126   : > { %v600_v3 = vpop.permute.xlu1 %599  ;;  %v598_v50 = vpop.permute.xlu0 %597 }
 0x127   : > { %667 = vst.msk [vmem:[#allocation2 + $0xe8] sm:$0xff] %vm637_vm2, %v600_v3  ;;  %v749_v51 = vpop.permute.xlu2 %748 }
 0x128   : > { %666 = vst.msk [vmem:[#allocation2 + $0xe0] sm:$0xff] %vm637_vm2, %v598_v50  ;;  %v867_v4 = vld [vmem:[#allocation2 + $0x20] sm:$0xff] }
 0x129   : > { %838 = vst.msk [vmem:[#allocation2 + $0x38] sm:$0xff] %vm830_vm3, %v749_v51  ;;  %v1258_v50 = vld [vmem:[%s2747_s24 + $0xe1] sm:$0xff] }
 0x12c   : > { %1563 = vrot.lane.b32.xlu1 %v2757_v2, %s2686_s26  ;;  %1371 = vrot.lane.b32.xlu0 %v2494_v0, %s2685_s25 }
 0x12d   : > { %1405 = vrot.lane.b32.xlu2 %v2511_v40, %s2685_s25 }
 0x12e   : > { %v735_v20 = vpop.permute.xlu1 %734  ;;  %v604_v52 = vpop.permute.xlu0 %603 }
 0x12f   : > { %831 = vst.msk [vmem:[#allocation2] sm:$0xff] %vm830_vm3, %v735_v20  ;;  %v755_v53 = vpop.permute.xlu2 %754 }
 0x130   : > { %669 = vst.msk [vmem:[#allocation2 + $0xf8] sm:$0xff] %vm637_vm2, %v604_v52  ;;  %v870_v44 = vld [vmem:[#allocation2 + $0x38] sm:$0xff] }
 0x131   : > { %841 = vst.msk [vmem:[#allocation2 + $0x50] sm:$0xff] %vm830_vm3, %v755_v53  ;;  %v1241_v52 = vld [vmem:[%s2747_s24 + $0x19] sm:$0xff] }
 0x134   : > { %1597 = vrot.lane.b32.xlu1 %v2852_v22, %s2686_s26  ;;  %1755 = vrot.lane.b32.xlu0 %v2496_v54, %s2687_s27 }
 0x135   : > { %1789 = vrot.lane.b32.xlu2 %v2513_v55, %s2687_s27 }
 0x136   : > { %v741_v2 = vpop.permute.xlu1 %740  ;;  %v739_v56 = vpop.permute.xlu0 %738  ;;  %v863_v57 = vld [vmem:[#allocation2] sm:$0xff] }
 0x137   : > { %834 = vst.msk [vmem:[#allocation2 + $0x18] sm:$0xff] %vm830_vm3, %v741_v2  ;;  %2430 = vmatmul.msk.f32.vlgmr.msra.gmra.mxu0 %vm900_vm4, %v863_v57  ;;  %v761_v58 = vpop.permute.xlu2 %760  ;;  %v2501_v57 = vld [vmem:[%s2747_s24 + $0x6a] sm:$0xff] }
 0x138   : > { %833 = vst.msk [vmem:[#allocation2 + $0x10] sm:$0xff] %vm830_vm3, %v739_v56  ;;  %v3282_v56 = vld [vmem:[%s2747_s24 + $0x139] sm:$0xff] }
 0x139   : > { %844 = vst.msk [vmem:[#allocation2 + $0x68] sm:$0xff] %vm830_vm3, %v761_v58  ;;  %v2470_v58 = vld [vmem:[%s2747_s24 + $0x79] sm:$0xff] }
 0x13a   : > { %1271 = vst.msk [vmem:[#allocation2] sm:$0xff] %vm248_vm0, %v1239_v34 }
 0x13c   : > { %1565 = vrot.lane.b32.xlu1 %v2766_v5, %s2686_s26  ;;  %1373 = vrot.lane.b32.xlu0 %v2495_v48, %s2685_s25 }
 0x13d   : > { %1407 = vrot.lane.b32.xlu2 %v2512_v49, %s2685_s25 }
 0x13e   : > { %v747_v22 = vpop.permute.xlu1 %746  ;;  %v745_v59 = vpop.permute.xlu0 %744  ;;  %v866_v16 = vld [vmem:[#allocation2 + $0x18] sm:$0xff] }
 0x13f   : > { %837 = vst.msk [vmem:[#allocation2 + $0x30] sm:$0xff] %vm830_vm3, %v747_v22  ;;  %2431 = vmatmul.msk.f32.gmra.mxu0 %vm900_vm4, %v864_v60  ;;  %v767_v61 = vpop.permute.xlu2 %766  ;;  %v865_v9 = vld [vmem:[#allocation2 + $0x10] sm:$0xff]  ;;  %v3289_v22 = vld [vmem:[%s2747_s24 + $0x13a] sm:$0xff] }
 0x140   : > { %836 = vst.msk [vmem:[#allocation2 + $0x28] sm:$0xff] %vm830_vm3, %v745_v59  ;;  %v3295_v60 = vld [vmem:[%s2747_s24 + $0x81] sm:$0xff] }
 0x141   : > { %847 = vst.msk [vmem:[#allocation2 + $0x80] sm:$0xff] %vm830_vm3, %v767_v61 }
 0x142   : > { %1273 = vst.msk [vmem:[#allocation2 + $0x10] sm:$0xff] %vm248_vm0, %v1241_v52 }
 0x144   : > { %1599 = vrot.lane.b32.xlu1 %v2849_v21, %s2686_s26  ;;  %1757 = vrot.lane.b32.xlu0 %v2497_v62, %s2687_s27 }
 0x145   : > { %1791 = vrot.lane.b32.xlu2 %v2514_v10, %s2687_s27 }
 0x146   : > { %v753_v5 = vpop.permute.xlu1 %752  ;;  %v751_v11 = vpop.permute.xlu0 %750  ;;  %v869_v38 = vld [vmem:[#allocation2 + $0x30] sm:$0xff] }
 0x147   : > { %840 = vst.msk [vmem:[#allocation2 + $0x48] sm:$0xff] %vm830_vm3, %v753_v5  ;;  %2432 = vmatmul.msk.f32.gmra.mxu0 %vm900_vm4, %v865_v9  ;;  %v773_v13 = vpop.permute.xlu2 %772  ;;  %v868_v33 = vld [vmem:[#allocation2 + $0x28] sm:$0xff]  ;;  %v1259_v9 = vld [vmem:[%s2747_s24 + $0xf1] sm:$0xff] }
 0x148   : > { %839 = vst.msk [vmem:[#allocation2 + $0x40] sm:$0xff] %vm830_vm3, %v751_v11  ;;  %v879_v14 = vld [vmem:[#allocation2 + $0x80] sm:$0xff]  ;;  %v3307_v11 = vld [vmem:[%s2747_s24 + $0x151] sm:$0xff] }
 0x149   : > { %850 = vst.msk [vmem:[#allocation2 + $0x98] sm:$0xff] %vm830_vm3, %v773_v13  ;;  %2446 = vmatmul.msk.f32.vlgmr.msra.gmra.mxu2 %vm900_vm4, %v879_v14 }
 0x14a   : > { %1287 = vst.msk [vmem:[#allocation2 + $0x80] sm:$0xff] %vm248_vm0, %v3201_v27 }
 0x14c   : > { %1567 = vrot.lane.b32.xlu1 %v2777_v7, %s2686_s26  ;;  %1375 = vrot.lane.b32.xlu0 %v2496_v54, %s2685_s25  ;;  %v2515_v7 = vld [vmem:[%s2747_s24 + $0x112] sm:$0xff] }
 0x14d   : > { %1409 = vrot.lane.b32.xlu2 %v2513_v55, %s2685_s25  ;;  %v873_v55 = vld [vmem:[#allocation2 + $0x50] sm:$0xff] }
 0x14e   : > { %v759_v21 = vpop.permute.xlu1 %758  ;;  %v757_v12 = vpop.permute.xlu0 %756  ;;  %v3210_v30 = vld [vmem:[#allocation2 + $0x48] sm:$0xff]  ;;  %1281 = vst.msk [vmem:[#allocation2 + $0x50] sm:$0xff] %vm248_vm0, %v2470_v58 }
 0x14f   : > { %843 = vst.msk [vmem:[#allocation2 + $0x60] sm:$0xff] %vm830_vm3, %v759_v21  ;;  %2433 = vmatmul.msk.f32.gmra.mxu0 %vm900_vm4, %v866_v16  ;;  %v779_v17 = vpop.permute.xlu2 %778  ;;  %v871_v49 = vld [vmem:[#allocation2 + $0x40] sm:$0xff] }
 0x150   : > { %842 = vst.msk [vmem:[#allocation2 + $0x58] sm:$0xff] %vm830_vm3, %v757_v12  ;;  %v882_v3 = vld [vmem:[#allocation2 + $0x98] sm:$0xff]  ;;  %v1242_v21 = vld [vmem:[%s2747_s24 + $0x21] sm:$0xff] }
 0x151   : > { %853 = vst.msk [vmem:[#allocation2 + $0xb0] sm:$0xff] %vm830_vm3, %v779_v17 }
 0x152   : > { %1290 = vst.msk [vmem:[#allocation2 + $0x98] sm:$0xff] %vm248_vm0, %v1258_v50  ;;  %v1261_v50 = vld [vmem:[%s2747_s24 + $0x109] sm:$0xff] }
 0x153   : > { %1274 = vst.msk [vmem:[#allocation2 + $0x18] sm:$0xff] %vm248_vm0, %v1242_v21 }
 0x154   : > { %1601 = vrot.lane.b32.xlu1 %v2855_v23, %s2686_s26  ;;  %1759 = vrot.lane.b32.xlu0 %v2498_v15, %s2687_s27  ;;  %v3208_v23 = vld [vmem:[%s2747_s24 + $0x69] sm:$0xff] }
 0x155   : > { %1793 = vrot.lane.b32.xlu2 %v2515_v7, %s2687_s27  ;;  %1280 = vst.msk [vmem:[#allocation2 + $0x48] sm:$0xff] %vm248_vm0, %v3208_v23 }
 0x156   : > { %v765_v63 = vpop.permute.xlu1 %764  ;;  %v763_v1 = vpop.permute.xlu0 %762 }
 0x157   : > { %846 = vst.msk [vmem:[#allocation2 + $0x78] sm:$0xff] %vm830_vm3, %v765_v63  ;;  %2434 = vmatmul.msk.f32.gmra.mxu0 %vm900_vm4, %v867_v4  ;;  %v785_v29 = vpop.permute.xlu2 %784  ;;  %v874_v59 = vld [vmem:[#allocation2 + $0x58] sm:$0xff]  ;;  %v875_v63 = vld [vmem:[#allocation2 + $0x60] sm:$0xff] }
 0x158   : > { %845 = vst.msk [vmem:[#allocation2 + $0x70] sm:$0xff] %vm830_vm3, %v763_v1  ;;  %v885_v12 = vld [vmem:[#allocation2 + $0xb0] sm:$0xff]  ;;  %v3333_v4 = vld [vmem:[%s2747_s24 + $0x141] sm:$0xff] }
 0x159   : > { %856 = vst.msk [vmem:[#allocation2 + $0xc8] sm:$0xff] %vm830_vm3, %v785_v29  ;;  %v3328_v1 = vld [vmem:[%s2747_s24 + $0x91] sm:$0xff] }
 0x15a   : > { %1282 = vst.msk [vmem:[#allocation2 + $0x58] sm:$0xff] %vm248_vm0, %v3295_v60 }
 0x15b   : > { %1283 = vst.msk [vmem:[#allocation2 + $0x60] sm:$0xff] %vm248_vm0, %v3328_v1 }
 0x15c   : > { %1569 = vrot.lane.b32.xlu1 %v2774_v6, %s2686_s26  ;;  %1377 = vrot.lane.b32.xlu0 %v2497_v62, %s2685_s25  ;;  %1293 = vst.msk [vmem:[#allocation2 + $0xb0] sm:$0xff] %vm248_vm0, %v1261_v50 }
 0x15d   : > { %1411 = vrot.lane.b32.xlu2 %v2514_v10, %s2685_s25 }
 0x15e   : > { %v771_v32 = vpop.permute.xlu1 %770  ;;  %v769_v26 = vpop.permute.xlu0 %768 }
 0x15f   : > { %849 = vst.msk [vmem:[#allocation2 + $0x90] sm:$0xff] %vm830_vm3, %v771_v32  ;;  %2435 = vmatmul.msk.f32.gmra.mxu0 %vm900_vm4, %v868_v33  ;;  %v1784_v6 = vpop.permute.xlu2 %1783  ;;  %v3347_v32 = vld [vmem:[%s2747_s24 + $0x142] sm:$0xff] }
 0x160   : > { %848 = vst.msk [vmem:[#allocation2 + $0x88] sm:$0xff] %vm830_vm3, %v769_v26  ;;  %v3351_v26 = vld [vmem:[%s2747_s24 + $0x159] sm:$0xff] }
 0x164   : > { %1603 = vrot.lane.b32.xlu1 %v2867_v25, %s2686_s26  ;;  %1761 = vrot.lane.b32.xlu0 %v2499_v35, %s2687_s27 }
 0x165   : > { %1795 = vrot.lane.b32.xlu2 %v2516_v19, %s2687_s27 }
 0x166   : > { %v777_v36 = vpop.permute.xlu1 %776  ;;  %v775_v37 = vpop.permute.xlu0 %774  ;;  %v881_v40 = vld [vmem:[#allocation2 + $0x90] sm:$0xff] }
 0x167   : > { %852 = vst.msk [vmem:[#allocation2 + $0xa8] sm:$0xff] %vm830_vm3, %v777_v36  ;;  %2436 = vmatmul.msk.f32.gmra.mxu0 %vm900_vm4, %v869_v38  ;;  %v880_v0 = vld [vmem:[#allocation2 + $0x88] sm:$0xff]  ;;  %v1402_v25 = vpop.permute.xlu2 %1401  ;;  %v1260_v38 = vld [vmem:[%s2747_s24 + $0xf9] sm:$0xff] }
 0x168   : > { %851 = vst.msk [vmem:[#allocation2 + $0xa0] sm:$0xff] %vm830_vm3, %v775_v37  ;;  %2447 = vmatmul.msk.f32.gmra.mxu2 %vm900_vm4, %v880_v0  ;;  %v3369_v0 = vld [vmem:[%s2747_s24 + $0x82] sm:$0xff] }
 0x169   : > { %1288 = vst.msk [vmem:[#allocation2 + $0x88] sm:$0xff] %vm248_vm0, %v3232_v39 }
 0x16a   : > { %1480 = vst.msk [vmem:[#allocation2 + $0x88] sm:$0xff] %vm441_vm1, %v1402_v25 }
 0x16b   : > { %1289 = vst.msk [vmem:[#allocation2 + $0x90] sm:$0xff] %vm248_vm0, %v1257_v41  ;;  %v877_v41 = vld [vmem:[#allocation2 + $0x70] sm:$0xff] }
 0x16c   : > { %1571 = vrot.lane.b32.xlu1 %v2780_v8, %s2686_s26  ;;  %1379 = vrot.lane.b32.xlu0 %v2498_v15, %s2685_s25 }
 0x16d   : > { %1413 = vrot.lane.b32.xlu2 %v2515_v7, %s2685_s25  ;;  %v3324_v7 = vld [vmem:[%s2747_s24 + $0x7a] sm:$0xff] }
 0x16e   : > { %v783_v42 = vpop.permute.xlu1 %782  ;;  %v781_v43 = vpop.permute.xlu0 %780  ;;  %v884_v10 = vld [vmem:[#allocation2 + $0xa8] sm:$0xff] }
 0x16f   : > { %855 = vst.msk [vmem:[#allocation2 + $0xc0] sm:$0xff] %vm830_vm3, %v783_v42  ;;  %2437 = vmatmul.msk.f32.gmra.mxu0 %vm900_vm4, %v870_v44  ;;  %v1786_v8 = vpop.permute.xlu2 %1785  ;;  %v883_v53 = vld [vmem:[#allocation2 + $0xa0] sm:$0xff]  ;;  %v888_v42 = vld [vmem:[#allocation2 + $0xc8] sm:$0xff]  ;;  %v3383_v44 = vld [vmem:[%s2747_s24 + $0x152] sm:$0xff] }
 0x170   : > { %854 = vst.msk [vmem:[#allocation2 + $0xb8] sm:$0xff] %vm830_vm3, %v781_v43  ;;  %2448 = vmatmul.msk.f32.gmra.mxu2 %vm900_vm4, %v881_v40 }
 0x171   : > { %1291 = vst.msk [vmem:[#allocation2 + $0xa0] sm:$0xff] %vm248_vm0, %v1259_v9  ;;  %v1245_v9 = vld [vmem:[%s2747_s24 + $0x49] sm:$0xff] }
 0x172   : > { %1292 = vst.msk [vmem:[#allocation2 + $0xa8] sm:$0xff] %vm248_vm0, %v1260_v38 }
 0x173   : > { %1277 = vst.msk [vmem:[#allocation2 + $0x30] sm:$0xff] %vm248_vm0, %v1245_v9  ;;  %v3563_v9 = vld [vmem:[%s2747_s24 + $0x189] sm:$0xff] }
 0x174   : > { %1605 = vrot.lane.b32.xlu1 %v2864_v24, %s2686_s26  ;;  %1763 = vrot.lane.b32.xlu0 %v2500_v18, %s2687_s27 }
 0x175   : > { %1797 = vrot.lane.b32.xlu2 %v3255_v46, %s2687_s27 }
 0x176   : > { %v1592_v47 = vpop.permute.xlu1 %1591  ;;  %v1400_v48 = vpop.permute.xlu0 %1399  ;;  %v887_v28 = vld [vmem:[#allocation2 + $0xc0] sm:$0xff] }
 0x177   : > { %1479 = vst.msk [vmem:[#allocation2 + $0x80] sm:$0xff] %vm441_vm1, %v1400_v48  ;;  %2438 = vmatmul.msk.f32.gmra.mxu0 %vm900_vm4, %v871_v49  ;;  %v1404_v24 = vpop.permute.xlu2 %1403 }
 0x178   : > { %1671 = vst.msk [vmem:[#allocation2 + $0x80] sm:$0xff] %vm637_vm2, %v1592_v47  ;;  %2449 = vmatmul.msk.f32.gmra.mxu2 %vm900_vm4, %v882_v3  ;;  %v1244_v47 = vld [vmem:[%s2747_s24 + $0x39] sm:$0xff]  ;;  %v3403_v3 = vld [vmem:[%s2747_s24 + $0x169] sm:$0xff] }
 0x179   : > { %1863 = vst.msk [vmem:[#allocation2 + $0x80] sm:$0xff] %vm830_vm3, %v1784_v6  ;;  %v876_v6 = vld [vmem:[#allocation2 + $0x68] sm:$0xff] }
 0x17a   : > { %1481 = vst.msk [vmem:[#allocation2 + $0x90] sm:$0xff] %vm441_vm1, %v1404_v24  ;;  %v3408_v24 = vld [vmem:[%s3902_s2] ss:$0 sm:$0xff] }
 0x17b   : > { %1276 = vst.msk [vmem:[#allocation2 + $0x28] sm:$0xff] %vm248_vm0, %v1244_v47 }
 0x17c   : > { %1573 = vrot.lane.b32.xlu1 %v3208_v23, %s2686_s26  ;;  %1381 = vrot.lane.b32.xlu0 %v2499_v35, %s2685_s25 }
 0x17d   : > { %1415 = vrot.lane.b32.xlu2 %v2516_v19, %s2685_s25  ;;  %v1243_v19 = vld [vmem:[%s2747_s24 + $0x31] sm:$0xff] }
 0x17e   : > { %v1560_v51 = vpop.permute.xlu1 %1559  ;;  %v1368_v20 = vpop.permute.xlu0 %1367  ;;  %1275 = vst.msk [vmem:[#allocation2 + $0x20] sm:$0xff] %vm248_vm0, %v1243_v19 }
 0x17f   : > { %1463 = vst.msk [vmem:[#allocation2] sm:$0xff] %vm441_vm1, %v1368_v20  ;;  %2439 = vmatmul.msk.f32.gmra.mxu0 %vm900_vm4, %v3210_v30  ;;  %v1788_v2 = vpop.permute.xlu2 %1787  ;;  %v886_v30 = vld [vmem:[#allocation2 + $0xb8] sm:$0xff] }
 0x180   : > { %1655 = vst.msk [vmem:[#allocation2] sm:$0xff] %vm637_vm2, %v1560_v51  ;;  %2450 = vmatmul.msk.f32.gmra.mxu2 %vm900_vm4, %v883_v53  ;;  %v1895_v54 = vld [vmem:[#allocation2 + $0x80] sm:$0xff] }
 0x181   : > { %2544 = vmatmul.msk.f32.vlgmr.msra.gmra.mxu3 %vm900_vm4, %v1895_v54 }
 0x184   : > { %1607 = vrot.lane.b32.xlu1 %v3282_v56, %s2686_s26  ;;  %1765 = vrot.lane.b32.xlu0 %v2501_v57, %s2687_s27 }
 0x185   : > { %1799 = vrot.lane.b32.xlu2 %v3289_v22, %s2687_s27 }
 0x186   : > { %v1594_v61 = vpop.permute.xlu1 %1593  ;;  %v1752_v62 = vpop.permute.xlu0 %1751 }
 0x187   : > { %1672 = vst.msk [vmem:[#allocation2 + $0x88] sm:$0xff] %vm637_vm2, %v1594_v61  ;;  %2440 = vmatmul.msk.f32.gmra.mxu0 %vm900_vm4, %v873_v55  ;;  %v1406_v5 = vpop.permute.xlu2 %1405 }
 0x188   : > { %1864 = vst.msk [vmem:[#allocation2 + $0x88] sm:$0xff] %vm830_vm3, %v1786_v8  ;;  %2451 = vmatmul.msk.f32.gmra.mxu2 %vm900_vm4, %v884_v10 }
 0x189   : > { %1847 = vst.msk [vmem:[#allocation2] sm:$0xff] %vm830_vm3, %v1752_v62 }
 0x18a   : > { %1482 = vst.msk [vmem:[#allocation2 + $0x98] sm:$0xff] %vm441_vm1, %v1406_v5 }
 0x18c   : > { %786 = vrot.lane.b32.xlu1 %v3307_v11, %s2687_s27  ;;  %1383 = vrot.lane.b32.xlu0 %v2500_v18, %s2685_s25  ;;  %v878_v18 = vld [vmem:[#allocation2 + $0x78] sm:$0xff] }
 0x18d   : > { %1575 = vrot.lane.b32.xlu2 %v2470_v58, %s2686_s26  ;;  %v3435_v58 = vld [vmem:[%s2747_s24 + $0x15a] sm:$0xff] }
 0x18e   : > { %v1562_v13 = vpop.permute.xlu1 %1561  ;;  %v1370_v14 = vpop.permute.xlu0 %1369 }
 0x18f   : > { %1464 = vst.msk [vmem:[#allocation2 + $0x8] sm:$0xff] %vm441_vm1, %v1370_v14  ;;  %2441 = vmatmul.msk.f32.gmra.mxu0 %vm900_vm4, %v874_v59  ;;  %v1896_v16 = vld [vmem:[#allocation2 + $0x88] sm:$0xff]  ;;  %v1790_v15 = vpop.permute.xlu2 %1789 }
 0x190   : > { %1656 = vst.msk [vmem:[#allocation2 + $0x8] sm:$0xff] %vm637_vm2, %v1562_v13  ;;  %2452 = vmatmul.msk.f32.gmra.mxu2 %vm900_vm4, %v885_v12  ;;  %v1879_v17 = vld [vmem:[#allocation2] sm:$0xff]  ;;  %2545 = vmatmul.msk.f32.gmra.mxu3 %vm900_vm4, %v1896_v16  ;;  %v3459_v12 = vld [vmem:[%s2747_s24 + $0x171] sm:$0xff] }
 0x191   : > { %2528 = vmatmul.msk.f32.vlgmr.msra.gmra.mxu1 %vm900_vm4, %v1879_v17  ;;  %v1262_v16 = vld [vmem:[%s2747_s24 + $0x111] sm:$0xff] }
 0x192   : > { %1294 = vst.msk [vmem:[#allocation2 + $0xb8] sm:$0xff] %vm248_vm0, %v1262_v16 }
 0x194   : > { %1767 = vrot.lane.b32.xlu1 %v3324_v7, %s2687_s27  ;;  %1417 = vrot.lane.b32.xlu0 %v3255_v46, %s2685_s25 }
 0x195   : > { %1609 = vrot.lane.b32.xlu2 %v3333_v4, %s2686_s26 }
 0x196   : > { %v1596_v29 = vpop.permute.xlu1 %1595  ;;  %v1754_v23 = vpop.permute.xlu0 %1753 }
 0x197   : > { %1673 = vst.msk [vmem:[#allocation2 + $0x90] sm:$0xff] %vm637_vm2, %v1596_v29  ;;  %2442 = vmatmul.msk.f32.gmra.mxu0 %vm900_vm4, %v875_v63  ;;  %v1408_v31 = vpop.permute.xlu2 %1407 }
 0x198   : > { %1865 = vst.msk [vmem:[#allocation2 + $0x90] sm:$0xff] %vm830_vm3, %v1788_v2  ;;  %2453 = vmatmul.msk.f32.gmra.mxu2 %vm900_vm4, %v886_v30  ;;  %v3477_v30 = vld [vmem:[%s2747_s24 + $0x9a] sm:$0xff] }
 0x199   : > { %1848 = vst.msk [vmem:[#allocation2 + $0x8] sm:$0xff] %vm830_vm3, %v1754_v23 }
 0x19a   : > { %1483 = vst.msk [vmem:[#allocation2 + $0xa0] sm:$0xff] %vm441_vm1, %v1408_v31 }
 0x19c   : > { %1385 = vrot.lane.b32.xlu1 %v2501_v57, %s2685_s25  ;;  %1801 = vrot.lane.b32.xlu0 %v3347_v32, %s2687_s27  ;;  %v3429_v57 = vld [vmem:[%s2747_s24 + $0x92] sm:$0xff] }
 0x19d   : > { %788 = vrot.lane.b32.xlu2 %v3351_v26, %s2687_s27 }
 0x19e   : > { %v1564_v33 = vpop.permute.xlu1 %1563  ;;  %v1372_v34 = vpop.permute.xlu0 %1371 }
 0x19f   : > { %1465 = vst.msk [vmem:[#allocation2 + $0x10] sm:$0xff] %vm441_vm1, %v1372_v34  ;;  %2443 = vmatmul.msk.f32.gmra.mxu0 %vm900_vm4, %v876_v6  ;;  %v1897_v35 = vld [vmem:[#allocation2 + $0x90] sm:$0xff]  ;;  %v1792_v37 = vpop.permute.xlu2 %1791 }
 0x1a0   : > { %1657 = vst.msk [vmem:[#allocation2 + $0x10] sm:$0xff] %vm637_vm2, %v1564_v33  ;;  %2454 = vmatmul.msk.f32.gmra.mxu2 %vm900_vm4, %v887_v28  ;;  %v1880_v36 = vld [vmem:[#allocation2 + $0x8] sm:$0xff]  ;;  %2546 = vmatmul.msk.f32.gmra.mxu3 %vm900_vm4, %v1897_v35  ;;  %v3489_v6 = vld [vmem:[%s2747_s24 + $0xb1] sm:$0xff] }
 0x1a1   : > { %2529 = vmatmul.msk.f32.gmra.mxu1 %vm900_vm4, %v1880_v36  ;;  %1286 = vst.msk [vmem:[#allocation2 + $0x78] sm:$0xff] %vm248_vm0, %v3489_v6 }
 0x1a4   : > { %1419 = vrot.lane.b32.xlu1 %v3289_v22, %s2685_s25  ;;  %1577 = vrot.lane.b32.xlu0 %v3295_v60, %s2686_s26  ;;  %v2473_v22 = vld [vmem:[%s2747_s24 + $0x99] sm:$0xff]  ;;  %v3443_v60 = vld [vmem:[%s2747_s24 + $0xa9] sm:$0xff] }
 0x1a5   : > { %1769 = vrot.lane.b32.xlu2 %v3369_v0, %s2687_s27  ;;  %1284 = vst.msk [vmem:[#allocation2 + $0x68] sm:$0xff] %vm248_vm0, %v2473_v22 }
 0x1a6   : > { %v1598_v25 = vpop.permute.xlu1 %1597  ;;  %v1756_v40 = vpop.permute.xlu0 %1755  ;;  %1285 = vst.msk [vmem:[#allocation2 + $0x70] sm:$0xff] %vm248_vm0, %v3443_v60 }
 0x1a7   : > { %1674 = vst.msk [vmem:[#allocation2 + $0x98] sm:$0xff] %vm637_vm2, %v1598_v25  ;;  %2444 = vmatmul.msk.f32.gmra.mxu0 %vm900_vm4, %v877_v41  ;;  %v1410_v43 = vpop.permute.xlu2 %1409  ;;  %v1246_v25 = vld [vmem:[%s2747_s24 + $0x51] sm:$0xff] }
 0x1a8   : > { %1866 = vst.msk [vmem:[#allocation2 + $0x98] sm:$0xff] %vm830_vm3, %v1790_v15  ;;  %2455 = vmatmul.msk.f32.gmra.mxu2 %vm900_vm4, %v888_v42  ;;  %v3501_v41 = vld [vmem:[%s2747_s24 + $0x16a] sm:$0xff]  ;;  %v1263_v42 = vld [vmem:[%s2747_s24 + $0x121] sm:$0xff] }
 0x1a9   : > { %1849 = vst.msk [vmem:[#allocation2 + $0x10] sm:$0xff] %vm830_vm3, %v1756_v40 }
 0x1aa   : > { %1484 = vst.msk [vmem:[#allocation2 + $0xa8] sm:$0xff] %vm441_vm1, %v1410_v43 }
 0x1ab   : > { %1278 = vst.msk [vmem:[#allocation2 + $0x38] sm:$0xff] %vm248_vm0, %v1246_v25 }
 0x1ac   : > { %1803 = vrot.lane.b32.xlu1 %v3383_v44, %s2687_s27  ;;  %1611 = vrot.lane.b32.xlu0 %v3307_v11, %s2686_s26  ;;  %1295 = vst.msk [vmem:[#allocation2 + $0xc0] sm:$0xff] %vm248_vm0, %v1263_v42 }
 0x1ad   : > { %1387 = vrot.lane.b32.xlu2 %v3324_v7, %s2685_s25 }
 0x1ae   : > { %v1566_v45 = vpop.permute.xlu1 %1565  ;;  %v1374_v8 = vpop.permute.xlu0 %1373 }
 0x1af   : > { %1466 = vst.msk [vmem:[#allocation2 + $0x18] sm:$0xff] %vm441_vm1, %v1374_v8  ;;  %2445 = vmatmul.msk.f32.gmra.mxu0 %vm900_vm4, %v878_v18  ;;  %v1898_v46 = vld [vmem:[#allocation2 + $0x98] sm:$0xff]  ;;  %v3399_v49 = vpop.permute.xlu2 %1793 }
 0x1b0   : > { %1658 = vst.msk [vmem:[#allocation2 + $0x18] sm:$0xff] %vm637_vm2, %v1566_v45  ;;  %v1881_v48 = vld [vmem:[#allocation2 + $0x10] sm:$0xff]  ;;  %2547 = vmatmul.msk.f32.gmra.mxu3 %vm900_vm4, %v1898_v46 }
 0x1b1   : > { %2530 = vmatmul.msk.f32.gmra.mxu1 %vm900_vm4, %v1881_v48 }
 0x1b4   : > { %1579 = vrot.lane.b32.xlu1 %v3328_v1, %s2686_s26  ;;  %790 = vrot.lane.b32.xlu0 %v3403_v3, %s2687_s27  ;;  %v1014_v51 = vpop.f32.mrf.mxu0 }
 0x1b5   : > { %v1015_v20 = vadd.f32 %v3408_v24, %v1014_v51  ;;  %1421 = vrot.lane.b32.xlu2 %v3347_v32, %s2685_s25 }
 0x1b6   : > { %v1600_v52 = vpop.permute.xlu1 %1599  ;;  %v1758_v53 = vpop.permute.xlu0 %1757 }
 0x1b7   : > { %vm1110_vm5 = vcmp.gt.f32.partialorder %v1015_v20, 0.0  ;;  %v1142_v54 = vmul.f32 0.01, %v1015_v20  ;;  %1675 = vst.msk [vmem:[#allocation2 + $0xa0] sm:$0xff] %vm637_vm2, %v1600_v52  ;;  %v1412_v55 = vpop.permute.xlu2 %1411 }
 0x1b8   : > { %1867 = vst.msk [vmem:[#allocation2 + $0xa0] sm:$0xff] %vm830_vm3, %v1792_v37 }
 0x1b9   : > { %v1174_v2 = vsel %vm1110_vm5, %v1015_v20, %v1142_v54  ;;  %1850 = vst.msk [vmem:[#allocation2 + $0x18] sm:$0xff] %vm830_vm3, %v1758_v53 }
 0x1ba   : > { %1207 = vst.msk [vmem:[%s3423_s13] sm:$0xff] %vm1206_vm6, %v1174_v2 }
 0x1bb   : > { %1485 = vst.msk [vmem:[#allocation2 + $0xb0] sm:$0xff] %vm441_vm1, %v1412_v55 }
 0x1bc   : > { %1613 = vrot.lane.b32.xlu1 %v3351_v26, %s2686_s26  ;;  %1771 = vrot.lane.b32.xlu0 %v3429_v57, %s2687_s27  ;;  %v1017_v59 = vpop.f32.mrf.mxu0 }
 0x1bd   : > { %v1018_v61 = vadd.f32 %v3408_v24, %v1017_v59  ;;  %1805 = vrot.lane.b32.xlu2 %v3435_v58, %s2687_s27 }
 0x1be   : > { %v1568_v62 = vpop.permute.xlu1 %1567  ;;  %v1376_v10 = vpop.permute.xlu0 %1375 }
 0x1bf   : > { %vm1111_vm7 = vcmp.gt.f32.partialorder %v1018_v61, 0.0  ;;  %v1143_v5 = vmul.f32 0.01, %v1018_v61  ;;  %1467 = vst.msk [vmem:[#allocation2 + $0x20] sm:$0xff] %vm441_vm1, %v1376_v10  ;;  %v1899_v11 = vld [vmem:[#allocation2 + $0xa0] sm:$0xff]  ;;  %v3455_v14 = vpop.permute.xlu2 %1795 }
 0x1c0   : > { %1659 = vst.msk [vmem:[#allocation2 + $0x20] sm:$0xff] %vm637_vm2, %v1568_v62  ;;  %v1882_v13 = vld [vmem:[#allocation2 + $0x18] sm:$0xff]  ;;  %2548 = vmatmul.msk.f32.gmra.mxu3 %vm900_vm4, %v1899_v11 }
 0x1c1   : > { %v1175_v21 = vsel %vm1111_vm7, %v1018_v61, %v1143_v5  ;;  %2531 = vmatmul.msk.f32.gmra.mxu1 %vm900_vm4, %v1882_v13  ;;  %v1264_v13 = vld [vmem:[%s2747_s24 + $0x129] sm:$0xff] }
 0x1c2   : > { %1208 = vst.msk [vmem:[%s3423_s13 + $0x8] sm:$0xff] %vm1206_vm6, %v1175_v21 }
 0x1c3   : > { %1296 = vst.msk [vmem:[#allocation2 + $0xc8] sm:$0xff] %vm248_vm0, %v1264_v13 }
 0x1c4   : > { %792 = vrot.lane.b32.xlu1 %v3459_v12, %s2687_s27  ;;  %1389 = vrot.lane.b32.xlu0 %v3369_v0, %s2685_s25  ;;  %v1020_v17 = vpop.f32.mrf.mxu0 }
 0x1c5   : > { %v1021_v15 = vadd.f32 %v3408_v24, %v1020_v17  ;;  %1581 = vrot.lane.b32.xlu2 %v2473_v22, %s2686_s26  ;;  %v1247_v22 = vld [vmem:[%s2747_s24 + $0x61] sm:$0xff] }
 0x1c6   : > { %v1602_v7 = vpop.permute.xlu1 %1601  ;;  %v1760_v63 = vpop.permute.xlu0 %1759  ;;  %1279 = vst.msk [vmem:[#allocation2 + $0x40] sm:$0xff] %vm248_vm0, %v1247_v22 }
 0x1c7   : > { %vm1112_vm8 = vcmp.gt.f32.partialorder %v1021_v15, 0.0  ;;  %v1144_v1 = vmul.f32 0.01, %v1021_v15  ;;  %1676 = vst.msk [vmem:[#allocation2 + $0xa8] sm:$0xff] %vm637_vm2, %v1602_v7  ;;  %v1414_v29 = vpop.permute.xlu2 %1413 }
 0x1c8   : > { %1868 = vst.msk [vmem:[#allocation2 + $0xa8] sm:$0xff] %vm830_vm3, %v3399_v49 }
 0x1c9   : > { %v1176_v23 = vsel %vm1112_vm8, %v1021_v15, %v1144_v1  ;;  %1851 = vst.msk [vmem:[#allocation2 + $0x20] sm:$0xff] %vm830_vm3, %v1760_v63 }
 0x1ca   : > { %1209 = vst.msk [vmem:[%s3423_s13 + $0x10] sm:$0xff] %vm1206_vm6, %v1176_v23 }
 0x1cb   : > { %1486 = vst.msk [vmem:[#allocation2 + $0xb8] sm:$0xff] %vm441_vm1, %v1414_v29 }
 0x1cc   : > { %1773 = vrot.lane.b32.xlu1 %v3477_v30, %s2687_s27  ;;  %1423 = vrot.lane.b32.xlu0 %v3383_v44, %s2685_s25  ;;  %v1023_v31 = vpop.f32.mrf.mxu0  ;;  %v1062_v32 = vpop.f32.mrf.mxu2  ;;  %v3510_v44 = vld [vmem:[%s2747_s24 + $0x181] sm:$0xff] }
 0x1cd   : > { %v1024_v33 = vadd.f32 %v3408_v24, %v1023_v31  ;;  %v1063_v34 = vadd.f32 %v3408_v24, %v1062_v32  ;;  %1615 = vrot.lane.b32.xlu2 %v3403_v3, %s2686_s26  ;;  %v3528_v3 = vld [vmem:[%s2747_s24 + $0xaa] sm:$0xff] }
 0x1ce   : > { %v1570_v28 = vpop.permute.xlu1 %1569  ;;  %v1378_v35 = vpop.permute.xlu0 %1377 }
 0x1cf   : > { %vm1113_vm9 = vcmp.gt.f32.partialorder %v1024_v33, 0.0  ;;  %v1145_v19 = vmul.f32 0.01, %v1024_v33  ;;  %1468 = vst.msk [vmem:[#allocation2 + $0x28] sm:$0xff] %vm441_vm1, %v1378_v35  ;;  %v1900_v36 = vld [vmem:[#allocation2 + $0xa8] sm:$0xff]  ;;  %vm1126_vm10 = vcmp.gt.f32.partialorder %v1063_v34, 0.0  ;;  %v1798_v0 = vpop.permute.xlu2 %1797 }
 0x1d0   : > { %1660 = vst.msk [vmem:[#allocation2 + $0x28] sm:$0xff] %vm637_vm2, %v1570_v28  ;;  %v1883_v37 = vld [vmem:[#allocation2 + $0x20] sm:$0xff]  ;;  %2549 = vmatmul.msk.f32.gmra.mxu3 %vm900_vm4, %v1900_v36  ;;  %v1158_v38 = vmul.f32 0.01, %v1063_v34 }
 0x1d1   : > { %v1177_v40 = vsel %vm1113_vm9, %v1024_v33, %v1145_v19  ;;  %2532 = vmatmul.msk.f32.gmra.mxu1 %vm900_vm4, %v1883_v37  ;;  %v3586_v33 = vld [vmem:[%s2747_s24 + $0xb2] sm:$0xff] }
 0x1d2   : > { %1210 = vst.msk [vmem:[%s3423_s13 + $0x18] sm:$0xff] %vm1206_vm6, %v1177_v40  ;;  %v1190_v43 = vsel %vm1126_vm10, %v1063_v34, %v1158_v38 }
 0x1d3   : > { %1223 = vst.msk [vmem:[%s3423_s13 + $0x80] sm:$0xff] %vm1206_vm6, %v1190_v43 }
 0x1d4   : > { %1391 = vrot.lane.b32.xlu1 %v3429_v57, %s2685_s25  ;;  %1807 = vrot.lane.b32.xlu0 %v3501_v41, %s2687_s27  ;;  %v1026_v45 = vpop.f32.mrf.mxu0 }
 0x1d5   : > { %v1027_v8 = vadd.f32 %v3408_v24, %v1026_v45  ;;  %794 = vrot.lane.b32.xlu2 %v3510_v44, %s2687_s27 }
 0x1d6   : > { %v1604_v18 = vpop.permute.xlu1 %1603  ;;  %v1762_v46 = vpop.permute.xlu0 %1761 }
 0x1d7   : > { %vm1114_vm11 = vcmp.gt.f32.partialorder %v1027_v8, 0.0  ;;  %v1146_v47 = vmul.f32 0.01, %v1027_v8  ;;  %1677 = vst.msk [vmem:[#allocation2 + $0xb0] sm:$0xff] %vm637_vm2, %v1604_v18  ;;  %v1416_v48 = vpop.permute.xlu2 %1415 }
 0x1d8   : > { %1869 = vst.msk [vmem:[#allocation2 + $0xb0] sm:$0xff] %vm830_vm3, %v3455_v14 }
 0x1d9   : > { %v1178_v49 = vsel %vm1114_vm11, %v1027_v8, %v1146_v47  ;;  %1852 = vst.msk [vmem:[#allocation2 + $0x28] sm:$0xff] %vm830_vm3, %v1762_v46 }
 0x1da   : > { %1211 = vst.msk [vmem:[%s3423_s13 + $0x20] sm:$0xff] %vm1206_vm6, %v1178_v49 }
 0x1db   : > { %1487 = vst.msk [vmem:[#allocation2 + $0xc0] sm:$0xff] %vm441_vm1, %v1416_v48 }
 0x1dc   : > { %1425 = vrot.lane.b32.xlu1 %v3435_v58, %s2685_s25  ;;  %1583 = vrot.lane.b32.xlu0 %v3443_v60, %s2686_s26  ;;  %v1029_v50 = vpop.f32.mrf.mxu0  ;;  %v3544_v58 = vld [vmem:[%s2747_s24 + $0x172] sm:$0xff] }
 0x1dd   : > { %v1030_v51 = vadd.f32 %v3408_v24, %v1029_v50  ;;  %1775 = vrot.lane.b32.xlu2 %v3528_v3, %s2687_s27  ;;  %v2508_v50 = vld [vmem:[%s2747_s24 + $0xc2] sm:$0xff] }
 0x1de   : > { %v1572_v20 = vpop.permute.xlu1 %1571  ;;  %v1380_v52 = vpop.permute.xlu0 %1379 }
 0x1df   : > { %vm1115_vm12 = vcmp.gt.f32.partialorder %v1030_v51, 0.0  ;;  %v1147_v53 = vmul.f32 0.01, %v1030_v51  ;;  %1469 = vst.msk [vmem:[#allocation2 + $0x30] sm:$0xff] %vm441_vm1, %v1380_v52  ;;  %v1901_v54 = vld [vmem:[#allocation2 + $0xb0] sm:$0xff]  ;;  %v3540_v2 = vpop.permute.xlu2 %1799 }
 0x1e0   : > { %1661 = vst.msk [vmem:[#allocation2 + $0x30] sm:$0xff] %vm637_vm2, %v1572_v20  ;;  %v1884_v55 = vld [vmem:[#allocation2 + $0x28] sm:$0xff]  ;;  %2550 = vmatmul.msk.f32.gmra.mxu3 %vm900_vm4, %v1901_v54 }
 0x1e1   : > { %v1179_v57 = vsel %vm1115_vm12, %v1030_v51, %v1147_v53  ;;  %2533 = vmatmul.msk.f32.gmra.mxu1 %vm900_vm4, %v1884_v55  ;;  %v2525_v53 = vld [vmem:[%s2747_s24 + $0x18a] sm:$0xff] }
 0x1e2   : > { %1212 = vst.msk [vmem:[%s3423_s13 + $0x28] sm:$0xff] %vm1206_vm6, %v1179_v57 }
 0x1e4   : > { %1809 = vrot.lane.b32.xlu1 %v3544_v58, %s2687_s27  ;;  %1617 = vrot.lane.b32.xlu0 %v3459_v12, %s2686_s26  ;;  %v1032_v59 = vpop.f32.mrf.mxu0 }
 0x1e5   : > { %v1033_v60 = vadd.f32 %v3408_v24, %v1032_v59  ;;  %1393 = vrot.lane.b32.xlu2 %v3477_v30, %s2685_s25 }
 0x1e6   : > { %v1606_v61 = vpop.permute.xlu1 %1605  ;;  %v1764_v62 = vpop.permute.xlu0 %1763 }
 0x1e7   : > { %vm1116_vm13 = vcmp.gt.f32.partialorder %v1033_v60, 0.0  ;;  %v1148_v10 = vmul.f32 0.01, %v1033_v60  ;;  %1678 = vst.msk [vmem:[#allocation2 + $0xb8] sm:$0xff] %vm637_vm2, %v1606_v61  ;;  %v3559_v5 = vpop.permute.xlu2 %1575 }
 0x1e8   : > { %1870 = vst.msk [vmem:[#allocation2 + $0xb8] sm:$0xff] %vm830_vm3, %v1798_v0 }
 0x1e9   : > { %v1180_v11 = vsel %vm1116_vm13, %v1033_v60, %v1148_v10  ;;  %1853 = vst.msk [vmem:[#allocation2 + $0x30] sm:$0xff] %vm830_vm3, %v1764_v62 }
 0x1ea   : > { %1213 = vst.msk [vmem:[%s3423_s13 + $0x30] sm:$0xff] %vm1206_vm6, %v1180_v11 }
 0x1eb   : > { %v1065_v14 = vpop.f32.mrf.mxu2 }
 0x1ec   : > { %v1066_v21 = vadd.f32 %v3408_v24, %v1065_v14  ;;  %1585 = vrot.lane.b32.xlu1 %v3489_v6, %s2686_s26  ;;  %796 = vrot.lane.b32.xlu0 %v3563_v9, %s2687_s27  ;;  %v1035_v16 = vpop.f32.mrf.mxu0  ;;  %v2524_v6 = vld [vmem:[%s2747_s24 + $0x182] sm:$0xff]  ;;  %v2509_v14 = vld [vmem:[%s2747_s24 + $0xca] sm:$0xff] }
 0x1ed   : > { %v1036_v17 = vadd.f32 %v3408_v24, %v1035_v16  ;;  %1427 = vrot.lane.b32.xlu2 %v3501_v41, %s2685_s25 }
 0x1ee   : > { %vm1127_vm14 = vcmp.gt.f32.partialorder %v1066_v21, 0.0  ;;  %v1159_v15 = vmul.f32 0.01, %v1066_v21  ;;  %v1574_v7 = vpop.permute.xlu1 %1573  ;;  %v1382_v63 = vpop.permute.xlu0 %1381 }
 0x1ef   : > { %vm1117_vm15 = vcmp.gt.f32.partialorder %v1036_v17, 0.0  ;;  %v1149_v1 = vmul.f32 0.01, %v1036_v17  ;;  %1470 = vst.msk [vmem:[#allocation2 + $0x38] sm:$0xff] %vm441_vm1, %v1382_v63  ;;  %v1902_v29 = vld [vmem:[#allocation2 + $0xb8] sm:$0xff]  ;;  %v3580_v31 = vpop.permute.xlu2 %1609 }
 0x1f0   : > { %v1191_v23 = vsel %vm1127_vm14, %v1066_v21, %v1159_v15  ;;  %1662 = vst.msk [vmem:[#allocation2 + $0x38] sm:$0xff] %vm637_vm2, %v1574_v7  ;;  %v1885_v30 = vld [vmem:[#allocation2 + $0x30] sm:$0xff]  ;;  %2551 = vmatmul.msk.f32.gmra.mxu3 %vm900_vm4, %v1902_v29 }
 0x1f1   : > { %1224 = vst.msk [vmem:[%s3423_s13 + $0x88] sm:$0xff] %vm1206_vm6, %v1191_v23  ;;  %v1181_v32 = vsel %vm1117_vm15, %v1036_v17, %v1149_v1  ;;  %2534 = vmatmul.msk.f32.gmra.mxu1 %vm900_vm4, %v1885_v30 }
 0x1f2   : > { %1214 = vst.msk [vmem:[%s3423_s13 + $0x38] sm:$0xff] %vm1206_vm6, %v1181_v32 }
 0x1f3   : > { %v1068_v34 = vpop.f32.mrf.mxu2 }
 0x1f4   : > { %v1069_v28 = vadd.f32 %v3408_v24, %v1068_v34  ;;  %1619 = vrot.lane.b32.xlu1 %v3510_v44, %s2686_s26  ;;  %1777 = vrot.lane.b32.xlu0 %v3586_v33, %s2687_s27  ;;  %v1038_v35 = vpop.f32.mrf.mxu0 }
 0x1f5   : > { %v1039_v19 = vadd.f32 %v3408_v24, %v1038_v35  ;;  %1811 = vrot.lane.b32.xlu2 %v2524_v6, %s2687_s27 }
 0x1f6   : > { %vm1128_vm5 = vcmp.gt.f32.partialorder %v1069_v28, 0.0  ;;  %v1160_v36 = vmul.f32 0.01, %v1069_v28  ;;  %v1608_v37 = vpop.permute.xlu1 %1607  ;;  %v1766_v38 = vpop.permute.xlu0 %1765 }
 0x1f7   : > { %vm1118_vm7 = vcmp.gt.f32.partialorder %v1039_v19, 0.0  ;;  %v1150_v0 = vmul.f32 0.01, %v1039_v19  ;;  %1679 = vst.msk [vmem:[#allocation2 + $0xc0] sm:$0xff] %vm637_vm2, %v1608_v37  ;;  %v789_v40 = vpop.permute.xlu2 %788 }
 0x1f8   : > { %v1192_v25 = vsel %vm1128_vm5, %v1069_v28, %v1160_v36  ;;  %1871 = vst.msk [vmem:[#allocation2 + $0xc0] sm:$0xff] %vm830_vm3, %v3540_v2 }
 0x1f9   : > { %1225 = vst.msk [vmem:[%s3423_s13 + $0x90] sm:$0xff] %vm1206_vm6, %v1192_v25  ;;  %v1182_v41 = vsel %vm1118_vm7, %v1039_v19, %v1150_v0 }
 0x1fa   : > { %1215 = vst.msk [vmem:[%s3423_s13 + $0x40] sm:$0xff] %vm1206_vm6, %v1182_v41 }
 0x1fb   : > { %1854 = vst.msk [vmem:[#allocation2 + $0x38] sm:$0xff] %vm830_vm3, %v1766_v38  ;;  %v1071_v42 = vpop.f32.mrf.mxu2 }
 0x1fc   : > { %v1072_v43 = vadd.f32 %v3408_v24, %v1071_v42  ;;  %1587 = vrot.lane.b32.xlu1 %v3201_v27, %s2686_s26  ;;  %1395 = vrot.lane.b32.xlu0 %v3528_v3, %s2685_s25  ;;  %v1041_v44 = vpop.f32.mrf.mxu0  ;;  %858 = vst.msk [vmem:[#allocation2 + $0xd8] sm:$0xff] %vm830_vm3, %v789_v40 }
 0x1fd   : > { %v1042_v45 = vadd.f32 %v3408_v24, %v1041_v44  ;;  %1429 = vrot.lane.b32.xlu2 %v3544_v58, %s2685_s25 }
 0x1fe   : > { %vm1129_vm8 = vcmp.gt.f32.partialorder %v1072_v43, 0.0  ;;  %v1161_v8 = vmul.f32 0.01, %v1072_v43  ;;  %v787_v18 = vpop.permute.xlu1 %786  ;;  %v1384_v46 = vpop.permute.xlu0 %1383 }
 0x1ff   : > { %vm1119_vm9 = vcmp.gt.f32.partialorder %v1042_v45, 0.0  ;;  %v1151_v27 = vmul.f32 0.01, %v1042_v45  ;;  %857 = vst.msk [vmem:[#allocation2 + $0xd0] sm:$0xff] %vm830_vm3, %v787_v18  ;;  %v1903_v47 = vld [vmem:[#allocation2 + $0xc0] sm:$0xff]  ;;  %v3618_v49 = vpop.permute.xlu2 %1769 }
 0x200   : > { %v1193_v48 = vsel %vm1129_vm8, %v1072_v43, %v1161_v8  ;;  %1471 = vst.msk [vmem:[#allocation2 + $0x40] sm:$0xff] %vm441_vm1, %v1384_v46  ;;  %2552 = vmatmul.msk.f32.gmra.mxu3 %vm900_vm4, %v1903_v47 }
 0x201   : > { %1226 = vst.msk [vmem:[%s3423_s13 + $0x98] sm:$0xff] %vm1206_vm6, %v1193_v48  ;;  %v1183_v3 = vsel %vm1119_vm9, %v1042_v45, %v1151_v27 }
 0x202   : > { %1216 = vst.msk [vmem:[%s3423_s13 + $0x48] sm:$0xff] %vm1206_vm6, %v1183_v3  ;;  %v1886_v51 = vld [vmem:[#allocation2 + $0x38] sm:$0xff] }
 0x203   : > { %1663 = vst.msk [vmem:[#allocation2 + $0x40] sm:$0xff] %vm637_vm2, %v3559_v5  ;;  %2535 = vmatmul.msk.f32.gmra.mxu1 %vm900_vm4, %v1886_v51  ;;  %v1074_v20 = vpop.f32.mrf.mxu2  ;;  %v890_v52 = vld [vmem:[#allocation2 + $0xd8] sm:$0xff] }
 0x204   : > { %v1075_v54 = vadd.f32 %v3408_v24, %v1074_v20  ;;  %1621 = vrot.lane.b32.xlu1 %v3563_v9, %s2686_s26  ;;  %1779 = vrot.lane.b32.xlu0 %v2508_v50, %s2687_s27  ;;  %v1044_v55 = vpop.f32.mrf.mxu0  ;;  %v2075_v2 = vpop.f32.mrf.mxu3  ;;  %1298 = vst.msk [vmem:[#allocation2 + $0xd8] sm:$0xff] %vm248_vm0, %v3333_v4 }
 0x205   : > { %v1045_v57 = vadd.f32 %v3408_v24, %v1044_v55  ;;  %v2076_v58 = vadd.f32 %v3408_v24, %v2075_v2  ;;  %1813 = vrot.lane.b32.xlu2 %v2525_v53, %s2687_s27 }
 0x206   : > { %vm1130_vm10 = vcmp.gt.f32.partialorder %v1075_v54, 0.0  ;;  %v1162_v22 = vmul.f32 0.01, %v1075_v54  ;;  %v1768_v59 = vpop.permute.xlu1 %1767  ;;  %v1418_v60 = vpop.permute.xlu0 %1417  ;;  %v889_v61 = vld [vmem:[#allocation2 + $0xd0] sm:$0xff] }
 0x207   : > { %vm1120_vm11 = vcmp.gt.f32.partialorder %v1045_v57, 0.0  ;;  %v1152_v62 = vmul.f32 0.01, %v1045_v57  ;;  %vm2139_vm12 = vcmp.gt.f32.partialorder %v2076_v58, 0.0  ;;  %v2171_v10 = vmul.f32 0.01, %v2076_v58  ;;  %2456 = vmatmul.msk.f32.gmra.mxu2 %vm900_vm4, %v889_v61  ;;  %v1388_v5 = vpop.permute.xlu2 %1387 }
 0x208   : > { %v1194_v4 = vsel %vm1130_vm10, %v1075_v54, %v1162_v22  ;;  %1855 = vst.msk [vmem:[#allocation2 + $0x40] sm:$0xff] %vm830_vm3, %v1768_v59 }
 0x209   : > { %1227 = vst.msk [vmem:[%s3423_s13 + $0xa0] sm:$0xff] %vm1206_vm6, %v1194_v4  ;;  %v1184_v11 = vsel %vm1120_vm11, %v1045_v57, %v1152_v62  ;;  %v2203_v9 = vsel %vm2139_vm12, %v2076_v58, %v2171_v10 }
 0x20a   : > { %1217 = vst.msk [vmem:[%s3423_s13 + $0x50] sm:$0xff] %vm1206_vm6, %v1184_v11 }
 0x20b   : > { %2576 = vst.msk [vmem:[%s3423_s13 + $0x180] sm:$0xff] %vm1206_vm6, %v2203_v9  ;;  %v1077_v13 = vpop.f32.mrf.mxu2 }
 0x20c   : > { %1488 = vst.msk [vmem:[#allocation2 + $0xc8] sm:$0xff] %vm441_vm1, %v1418_v60  ;;  %v1078_v21 = vadd.f32 %v3408_v24, %v1077_v13  ;;  %1397 = vrot.lane.b32.xlu0 %v3586_v33, %s2685_s25  ;;  %v1047_v16 = vpop.f32.mrf.mxu0  ;;  %1589 = vrot.lane.b32.xlu1 %v3232_v39, %s2686_s26 }
 0x20d   : > { %1680 = vst.msk [vmem:[#allocation2 + $0xc8] sm:$0xff] %vm637_vm2, %v3580_v31  ;;  %v1048_v17 = vadd.f32 %v3408_v24, %v1047_v16  ;;  %1781 = vrot.lane.b32.xlu2 %v2509_v14, %s2687_s27 }
 0x20e   : > { %vm1131_vm13 = vcmp.gt.f32.partialorder %v1078_v21, 0.0  ;;  %v1163_v15 = vmul.f32 0.01, %v1078_v21  ;;  %v2027_v7 = vpop.f32.mrf.mxu1  ;;  %v1386_v63 = vpop.permute.xlu1 %1385  ;;  %1297 = vst.msk [vmem:[#allocation2 + $0xd0] sm:$0xff] %vm248_vm0, %v3282_v56 }
 0x20f   : > { %vm1121_vm14 = vcmp.gt.f32.partialorder %v1048_v17, 0.0  ;;  %v1153_v1 = vmul.f32 0.01, %v1048_v17  ;;  %v2028_v39 = vadd.f32 %v3408_v24, %v2027_v7  ;;  %1472 = vst.msk [vmem:[#allocation2 + $0x48] sm:$0xff] %vm441_vm1, %v1386_v63  ;;  %v1802_v29 = vpop.permute.xlu0 %1801  ;;  %v1887_v23 = vld [vmem:[#allocation2 + $0x40] sm:$0xff]  ;;  %2457 = vmatmul.msk.f32.gmra.mxu2 %vm900_vm4, %v890_v52  ;;  %v1422_v56 = vpop.permute.xlu2 %1421 }
 0x210   : > { %v1195_v30 = vsel %vm1131_vm13, %v1078_v21, %v1163_v15  ;;  %1872 = vst.msk [vmem:[#allocation2 + $0xc8] sm:$0xff] %vm830_vm3, %v1802_v29  ;;  %2536 = vmatmul.msk.f32.gmra.mxu1 %vm900_vm4, %v1887_v23 }
 0x211   : > { %1228 = vst.msk [vmem:[%s3423_s13 + $0xa8] sm:$0xff] %vm1206_vm6, %v1195_v30  ;;  %v1185_v31 = vsel %vm1121_vm14, %v1048_v17, %v1153_v1  ;;  %vm2123_vm15 = vcmp.gt.f32.partialorder %v2028_v39, 0.0  ;;  %v2155_v32 = vmul.f32 0.01, %v2028_v39 }
 0x212   : > { %1218 = vst.msk [vmem:[%s3423_s13 + $0x58] sm:$0xff] %vm1206_vm6, %v1185_v31 }
 0x213   : > { %v2187_v33 = vsel %vm2123_vm15, %v2028_v39, %v2155_v32  ;;  %v1080_v34 = vpop.f32.mrf.mxu2  ;;  %v2078_v6 = vpop.f32.mrf.mxu3  ;;  %1473 = vst.msk [vmem:[#allocation2 + $0x50] sm:$0xff] %vm441_vm1, %v1388_v5 }
 0x214   : > { %2560 = vst.msk [vmem:[%s3423_s13 + $0x100] sm:$0xff] %vm1206_vm6, %v2187_v33  ;;  %v1081_v28 = vadd.f32 %v3408_v24, %v1080_v34  ;;  %v2079_v35 = vadd.f32 %v3408_v24, %v2078_v6  ;;  %v1050_v19 = vpop.f32.mrf.mxu0 }
 0x215   : > { %v1051_v36 = vadd.f32 %v3408_v24, %v1050_v19  ;;  %1490 = vst.msk [vmem:[#allocation2 + $0xd8] sm:$0xff] %vm441_vm1, %v1422_v56 }
 0x216   : > { %vm1132_vm5 = vcmp.gt.f32.partialorder %v1081_v28, 0.0  ;;  %v1164_v37 = vmul.f32 0.01, %v1081_v28  ;;  %vm2140_vm7 = vcmp.gt.f32.partialorder %v2079_v35, 0.0  ;;  %v2172_v38 = vmul.f32 0.01, %v2079_v35  ;;  %v1420_v0 = vpop.permute.xlu1 %1419 }
 0x217   : > { %vm1122_vm8 = vcmp.gt.f32.partialorder %v1051_v36, 0.0  ;;  %v1154_v25 = vmul.f32 0.01, %v1051_v36  ;;  %1489 = vst.msk [vmem:[#allocation2 + $0xd0] sm:$0xff] %vm441_vm1, %v1420_v0  ;;  %v1578_v40 = vpop.permute.xlu0 %1577  ;;  %v1904_v41 = vld [vmem:[#allocation2 + $0xc8] sm:$0xff]  ;;  %v3678_v44 = vpop.permute.xlu2 %1805 }
 0x218   : > { %v1196_v42 = vsel %vm1132_vm5, %v1081_v28, %v1164_v37  ;;  %v2204_v43 = vsel %vm2140_vm7, %v2079_v35, %v2172_v38  ;;  %1664 = vst.msk [vmem:[#allocation2 + $0x48] sm:$0xff] %vm637_vm2, %v1578_v40  ;;  %2553 = vmatmul.msk.f32.gmra.mxu3 %vm900_vm4, %v1904_v41  ;;  %v1267_v28 = vld [vmem:[%s2747_s24 + $0x151] sm:$0xff] }
 0x219   : > { %1229 = vst.msk [vmem:[%s3423_s13 + $0xb0] sm:$0xff] %vm1206_vm6, %v1196_v42  ;;  %v1186_v45 = vsel %vm1122_vm8, %v1051_v36, %v1154_v25 }
 0x21a   : > { %2577 = vst.msk [vmem:[%s3423_s13 + $0x188] sm:$0xff] %vm1206_vm6, %v2204_v43 }
 0x21b   : > { %1219 = vst.msk [vmem:[%s3423_s13 + $0x60] sm:$0xff] %vm1206_vm6, %v1186_v45  ;;  %v1083_v8 = vpop.f32.mrf.mxu2 }
 0x21c   : > { %1856 = vst.msk [vmem:[#allocation2 + $0x48] sm:$0xff] %vm830_vm3, %v3618_v49  ;;  %v1084_v18 = vadd.f32 %v3408_v24, %v1083_v8  ;;  %v1053_v46 = vpop.f32.mrf.mxu0 }
 0x21d   : > { %v1054_v27 = vadd.f32 %v3408_v24, %v1053_v46 }
 0x21e   : > { %vm1133_vm9 = vcmp.gt.f32.partialorder %v1084_v18, 0.0  ;;  %v1165_v47 = vmul.f32 0.01, %v1084_v18  ;;  %v2030_v48 = vpop.f32.mrf.mxu1  ;;  %v1804_v3 = vpop.permute.xlu1 %1803 }
 0x21f   : > { %vm1123_vm10 = vcmp.gt.f32.partialorder %v1054_v27, 0.0  ;;  %v1155_v50 = vmul.f32 0.01, %v1054_v27  ;;  %v2031_v51 = vadd.f32 %v3408_v24, %v2030_v48  ;;  %v1612_v20 = vpop.permute.xlu0 %1611  ;;  %v3692_v49 = vpop.permute.xlu2 %1581 }
 0x220   : > { %v1197_v52 = vsel %vm1133_vm9, %v1084_v18, %v1165_v47  ;;  %1681 = vst.msk [vmem:[#allocation2 + $0xd0] sm:$0xff] %vm637_vm2, %v1612_v20 }
 0x221   : > { %1230 = vst.msk [vmem:[%s3423_s13 + $0xb8] sm:$0xff] %vm1206_vm6, %v1197_v52  ;;  %v1187_v53 = vsel %vm1123_vm10, %v1054_v27, %v1155_v50  ;;  %vm2124_vm11 = vcmp.gt.f32.partialorder %v2031_v51, 0.0  ;;  %v2156_v54 = vmul.f32 0.01, %v2031_v51 }
 0x222   : > { %1220 = vst.msk [vmem:[%s3423_s13 + $0x68] sm:$0xff] %vm1206_vm6, %v1187_v53 }
 0x223   : > { %v2188_v55 = vsel %vm2124_vm11, %v2031_v51, %v2156_v54  ;;  %1873 = vst.msk [vmem:[#allocation2 + $0xd0] sm:$0xff] %vm830_vm3, %v1804_v3  ;;  %v1888_v2 = vld [vmem:[#allocation2 + $0x48] sm:$0xff]  ;;  %v1086_v57 = vpop.f32.mrf.mxu2  ;;  %v2081_v58 = vpop.f32.mrf.mxu3 }
 0x224   : > { %2561 = vst.msk [vmem:[%s3423_s13 + $0x108] sm:$0xff] %vm1206_vm6, %v2188_v55  ;;  %2537 = vmatmul.msk.f32.gmra.mxu1 %vm900_vm4, %v1888_v2  ;;  %v1087_v22 = vadd.f32 %v3408_v24, %v1086_v57  ;;  %v2082_v59 = vadd.f32 %v3408_v24, %v2081_v58  ;;  %v1056_v60 = vpop.f32.mrf.mxu0  ;;  %v1269_v51 = vld [vmem:[%s2747_s24 + $0x169] sm:$0xff] }
 0x225   : > { %v1057_v61 = vadd.f32 %v3408_v24, %v1056_v60 }
 0x226   : > { %vm1134_vm12 = vcmp.gt.f32.partialorder %v1087_v22, 0.0  ;;  %v1166_v62 = vmul.f32 0.01, %v1087_v22  ;;  %vm2141_vm13 = vcmp.gt.f32.partialorder %v2082_v59, 0.0  ;;  %v2173_v10 = vmul.f32 0.01, %v2082_v59  ;;  %v1580_v4 = vpop.permute.xlu1 %1579 }
 0x227   : > { %vm1124_vm14 = vcmp.gt.f32.partialorder %v1057_v61, 0.0  ;;  %v1156_v5 = vmul.f32 0.01, %v1057_v61  ;;  %1665 = vst.msk [vmem:[#allocation2 + $0x50] sm:$0xff] %vm637_vm2, %v1580_v4  ;;  %v791_v11 = vpop.permute.xlu0 %790  ;;  %v3707_v14 = vpop.permute.xlu2 %1615 }
 0x228   : > { %v1198_v9 = vsel %vm1134_vm12, %v1087_v22, %v1166_v62  ;;  %v2205_v13 = vsel %vm2141_vm13, %v2082_v59, %v2173_v10  ;;  %859 = vst.msk [vmem:[#allocation2 + $0xe0] sm:$0xff] %vm830_vm3, %v791_v11 }
 0x229   : > { %1231 = vst.msk [vmem:[%s3423_s13 + $0xc0] sm:$0xff] %vm1206_vm6, %v1198_v9  ;;  %v1188_v21 = vsel %vm1124_vm14, %v1057_v61, %v1156_v5 }
 0x22a   : > { %2578 = vst.msk [vmem:[%s3423_s13 + $0x190] sm:$0xff] %vm1206_vm6, %v2205_v13  ;;  %v1905_v16 = vld [vmem:[#allocation2 + $0xd0] sm:$0xff] }
 0x22b   : > { %1221 = vst.msk [vmem:[%s3423_s13 + $0x70] sm:$0xff] %vm1206_vm6, %v1188_v21  ;;  %2554 = vmatmul.msk.f32.gmra.mxu3 %vm900_vm4, %v1905_v16  ;;  %v1089_v17 = vpop.f32.mrf.mxu2 }
 0x22c   : > { %v1090_v15 = vadd.f32 %v3408_v24, %v1089_v17  ;;  %v1059_v7 = vpop.f32.mrf.mxu0 }
 0x22d   : > { %v1060_v63 = vadd.f32 %v3408_v24, %v1059_v7 }
 0x22e   : > { %vm1135_vm15 = vcmp.gt.f32.partialorder %v1090_v15, 0.0  ;;  %v1167_v1 = vmul.f32 0.01, %v1090_v15  ;;  %v2033_v39 = vpop.f32.mrf.mxu1  ;;  %v1614_v29 = vpop.permute.xlu1 %1613 }
 0x22f   : > { %vm1125_vm5 = vcmp.gt.f32.partialorder %v1060_v63, 0.0  ;;  %v1157_v23 = vmul.f32 0.01, %v1060_v63  ;;  %v2034_v30 = vadd.f32 %v3408_v24, %v2033_v39  ;;  %1682 = vst.msk [vmem:[#allocation2 + $0xd8] sm:$0xff] %vm637_vm2, %v1614_v29  ;;  %v1772_v56 = vpop.permute.xlu0 %1771  ;;  %v891_v31 = vld [vmem:[#allocation2 + $0xe0] sm:$0xff]  ;;  %v795_v33 = vpop.permute.xlu2 %794 }
 0x230   : > { %v1199_v32 = vsel %vm1135_vm15, %v1090_v15, %v1167_v1  ;;  %1874 = vst.msk [vmem:[#allocation2 + $0xd8] sm:$0xff] %vm830_vm3, %v3678_v44  ;;  %2458 = vmatmul.msk.f32.gmra.mxu2 %vm900_vm4, %v891_v31 }
 0x231   : > { %1232 = vst.msk [vmem:[%s3423_s13 + $0xc8] sm:$0xff] %vm1206_vm6, %v1199_v32  ;;  %v1189_v34 = vsel %vm1125_vm5, %v1060_v63, %v1157_v23  ;;  %vm2125_vm7 = vcmp.gt.f32.partialorder %v2034_v30, 0.0  ;;  %v2157_v6 = vmul.f32 0.01, %v2034_v30 }
 0x232   : > { %1222 = vst.msk [vmem:[%s3423_s13 + $0x78] sm:$0xff] %vm1206_vm6, %v1189_v34 }
 0x233   : > { %v2189_v35 = vsel %vm2125_vm7, %v2034_v30, %v2157_v6  ;;  %1857 = vst.msk [vmem:[#allocation2 + $0x50] sm:$0xff] %vm830_vm3, %v1772_v56  ;;  %v2084_v19 = vpop.f32.mrf.mxu3 }
 0x234   : > { %2562 = vst.msk [vmem:[%s3423_s13 + $0x110] sm:$0xff] %vm1206_vm6, %v2189_v35  ;;  %v2085_v36 = vadd.f32 %v3408_v24, %v2084_v19 }
 0x235   : > { %1299 = vst.msk [vmem:[#allocation2 + $0xe0] sm:$0xff] %vm248_vm0, %v1267_v28 }
 0x236   : > { %vm2142_vm8 = vcmp.gt.f32.partialorder %v2085_v36, 0.0  ;;  %v2174_v37 = vmul.f32 0.01, %v2085_v36  ;;  %v793_v38 = vpop.permute.xlu1 %792  ;;  %861 = vst.msk [vmem:[#allocation2 + $0xf0] sm:$0xff] %vm830_vm3, %v795_v33 }
 0x237   : > { %860 = vst.msk [vmem:[#allocation2 + $0xe8] sm:$0xff] %vm830_vm3, %v793_v38  ;;  %v1390_v0 = vpop.permute.xlu0 %1389  ;;  %v1906_v25 = vld [vmem:[#allocation2 + $0xd8] sm:$0xff]  ;;  %v1776_v41 = vpop.permute.xlu2 %1775 }
 0x238   : > { %v2206_v40 = vsel %vm2142_vm8, %v2085_v36, %v2174_v37  ;;  %1474 = vst.msk [vmem:[#allocation2 + $0x58] sm:$0xff] %vm441_vm1, %v1390_v0  ;;  %2555 = vmatmul.msk.f32.gmra.mxu3 %vm900_vm4, %v1906_v25 }
 0x239   : > { %2579 = vst.msk [vmem:[%s3423_s13 + $0x198] sm:$0xff] %vm1206_vm6, %v2206_v40 }
 0x23a   : > { %1666 = vst.msk [vmem:[#allocation2 + $0x58] sm:$0xff] %vm637_vm2, %v3692_v49  ;;  %v1889_v42 = vld [vmem:[#allocation2 + $0x50] sm:$0xff] }
 0x23b   : > { %2538 = vmatmul.msk.f32.gmra.mxu1 %vm900_vm4, %v1889_v42 }
 0x23d   : > { %v893_v50 = vld [vmem:[#allocation2 + $0xf0] sm:$0xff] }
 0x23e   : > { %v2036_v43 = vpop.f32.mrf.mxu1  ;;  %v1774_v44 = vpop.permute.xlu1 %1773  ;;  %v892_v45 = vld [vmem:[#allocation2 + $0xe8] sm:$0xff]  ;;  %1301 = vst.msk [vmem:[#allocation2 + $0xf0] sm:$0xff] %vm248_vm0, %v1269_v51 }
 0x23f   : > { %v2037_v8 = vadd.f32 %v3408_v24, %v2036_v43  ;;  %1858 = vst.msk [vmem:[#allocation2 + $0x58] sm:$0xff] %vm830_vm3, %v1774_v44  ;;  %v1424_v18 = vpop.permute.xlu0 %1423  ;;  %2459 = vmatmul.msk.f32.gmra.mxu2 %vm900_vm4, %v892_v45  ;;  %v1394_v46 = vpop.permute.xlu2 %1393 }
 0x240   : > { %1491 = vst.msk [vmem:[#allocation2 + $0xe0] sm:$0xff] %vm441_vm1, %v1424_v18 }
 0x241   : > { %vm2126_vm9 = vcmp.gt.f32.partialorder %v2037_v8, 0.0  ;;  %v2158_v27 = vmul.f32 0.01, %v2037_v8  ;;  %1683 = vst.msk [vmem:[#allocation2 + $0xe0] sm:$0xff] %vm637_vm2, %v3707_v14 }
 0x242   : > { %1300 = vst.msk [vmem:[#allocation2 + $0xe8] sm:$0xff] %vm248_vm0, %v3351_v26 }
 0x243   : > { %v2190_v47 = vsel %vm2126_vm9, %v2037_v8, %v2158_v27  ;;  %v2087_v48 = vpop.f32.mrf.mxu3  ;;  %1476 = vst.msk [vmem:[#allocation2 + $0x68] sm:$0xff] %vm441_vm1, %v1394_v46 }
 0x244   : > { %2563 = vst.msk [vmem:[%s3423_s13 + $0x118] sm:$0xff] %vm1206_vm6, %v2190_v47  ;;  %v2088_v3 = vadd.f32 %v3408_v24, %v2087_v48 }
 0x246   : > { %vm2143_vm10 = vcmp.gt.f32.partialorder %v2088_v3, 0.0  ;;  %v2175_v20 = vmul.f32 0.01, %v2088_v3  ;;  %v1392_v52 = vpop.permute.xlu1 %1391  ;;  %v1890_v49 = vld [vmem:[#allocation2 + $0x58] sm:$0xff] }
 0x247   : > { %1475 = vst.msk [vmem:[#allocation2 + $0x60] sm:$0xff] %vm441_vm1, %v1392_v52  ;;  %v1808_v26 = vpop.permute.xlu0 %1807  ;;  %2539 = vmatmul.msk.f32.gmra.mxu1 %vm900_vm4, %v1890_v49  ;;  %2460 = vmatmul.msk.f32.gmra.mxu2 %vm900_vm4, %v893_v50  ;;  %v1428_v54 = vpop.permute.xlu2 %1427 }
 0x248   : > { %v2207_v53 = vsel %vm2143_vm10, %v2088_v3, %v2175_v20  ;;  %1875 = vst.msk [vmem:[#allocation2 + $0xe0] sm:$0xff] %vm830_vm3, %v1808_v26 }
 0x249   : > { %2580 = vst.msk [vmem:[%s3423_s13 + $0x1a0] sm:$0xff] %vm1206_vm6, %v2207_v53 }
 0x24a   : > { %1493 = vst.msk [vmem:[#allocation2 + $0xf0] sm:$0xff] %vm441_vm1, %v1428_v54 }
 0x24e   : > { %v2039_v55 = vpop.f32.mrf.mxu1  ;;  %v1426_v2 = vpop.permute.xlu1 %1425 }
 0x24f   : > { %v2040_v57 = vadd.f32 %v3408_v24, %v2039_v55  ;;  %1492 = vst.msk [vmem:[#allocation2 + $0xe8] sm:$0xff] %vm441_vm1, %v1426_v2  ;;  %v1584_v58 = vpop.permute.xlu0 %1583  ;;  %v1907_v22 = vld [vmem:[#allocation2 + $0xe0] sm:$0xff]  ;;  %v1812_v17 = vpop.permute.xlu2 %1811 }
 0x250   : > { %1667 = vst.msk [vmem:[#allocation2 + $0x60] sm:$0xff] %vm637_vm2, %v1584_v58  ;;  %2556 = vmatmul.msk.f32.gmra.mxu3 %vm900_vm4, %v1907_v22 }
 0x251   : > { %vm2127_vm11 = vcmp.gt.f32.partialorder %v2040_v57, 0.0  ;;  %v2159_v59 = vmul.f32 0.01, %v2040_v57  ;;  %1859 = vst.msk [vmem:[#allocation2 + $0x60] sm:$0xff] %vm830_vm3, %v1776_v41 }
 0x253   : > { %v2191_v60 = vsel %vm2127_vm11, %v2040_v57, %v2159_v59  ;;  %v2090_v61 = vpop.f32.mrf.mxu3 }
 0x254   : > { %2564 = vst.msk [vmem:[%s3423_s13 + $0x120] sm:$0xff] %vm1206_vm6, %v2191_v60  ;;  %v2091_v62 = vadd.f32 %v3408_v24, %v2090_v61 }
 0x256   : > { %vm2144_vm12 = vcmp.gt.f32.partialorder %v2091_v62, 0.0  ;;  %v2176_v10 = vmul.f32 0.01, %v2091_v62  ;;  %v1810_v4 = vpop.permute.xlu1 %1809 }
 0x257   : > { %v1618_v5 = vpop.permute.xlu0 %1617  ;;  %v1430_v32 = vpop.permute.xlu2 %1429 }
 0x258   : > { %v2208_v11 = vsel %vm2144_vm12, %v2091_v62, %v2176_v10  ;;  %1684 = vst.msk [vmem:[#allocation2 + $0xe8] sm:$0xff] %vm637_vm2, %v1618_v5  ;;  %v1891_v9 = vld [vmem:[#allocation2 + $0x60] sm:$0xff] }
 0x259   : > { %2581 = vst.msk [vmem:[%s3423_s13 + $0x1a8] sm:$0xff] %vm1206_vm6, %v2208_v11  ;;  %2540 = vmatmul.msk.f32.gmra.mxu1 %vm900_vm4, %v1891_v9 }
 0x25a   : > { %1876 = vst.msk [vmem:[#allocation2 + $0xe8] sm:$0xff] %vm830_vm3, %v1810_v4 }
 0x25e   : > { %v2042_v13 = vpop.f32.mrf.mxu1  ;;  %v1586_v14 = vpop.permute.xlu1 %1585 }
 0x25f   : > { %v2043_v21 = vadd.f32 %v3408_v24, %v2042_v13  ;;  %1668 = vst.msk [vmem:[#allocation2 + $0x68] sm:$0xff] %vm637_vm2, %v1586_v14  ;;  %v797_v16 = vpop.permute.xlu0 %796  ;;  %v1814_v0 = vpop.permute.xlu2 %1813 }
 0x260   : > { %862 = vst.msk [vmem:[#allocation2 + $0xf8] sm:$0xff] %vm830_vm3, %v797_v16 }
 0x261   : > { %vm2128_vm13 = vcmp.gt.f32.partialorder %v2043_v21, 0.0  ;;  %v2160_v15 = vmul.f32 0.01, %v2043_v21  ;;  %v1908_v7 = vld [vmem:[#allocation2 + $0xe8] sm:$0xff] }
 0x262   : > { %2557 = vmatmul.msk.f32.gmra.mxu3 %vm900_vm4, %v1908_v7 }
 0x263   : > { %v2192_v63 = vsel %vm2128_vm13, %v2043_v21, %v2160_v15  ;;  %v2093_v1 = vpop.f32.mrf.mxu3 }
 0x264   : > { %2565 = vst.msk [vmem:[%s3423_s13 + $0x128] sm:$0xff] %vm1206_vm6, %v2192_v63  ;;  %v2094_v39 = vadd.f32 %v3408_v24, %v2093_v1 }
 0x266   : > { %vm2145_vm14 = vcmp.gt.f32.partialorder %v2094_v39, 0.0  ;;  %v2177_v29 = vmul.f32 0.01, %v2094_v39  ;;  %v1620_v23 = vpop.permute.xlu1 %1619 }
 0x267   : > { %1685 = vst.msk [vmem:[#allocation2 + $0xf0] sm:$0xff] %vm637_vm2, %v1620_v23  ;;  %v1778_v30 = vpop.permute.xlu0 %1777  ;;  %v894_v56 = vld [vmem:[#allocation2 + $0xf8] sm:$0xff]  ;;  %v1782_v8 = vpop.permute.xlu2 %1781 }
 0x268   : > { %v2209_v31 = vsel %vm2145_vm14, %v2094_v39, %v2177_v29  ;;  %1860 = vst.msk [vmem:[#allocation2 + $0x68] sm:$0xff] %vm830_vm3, %v1778_v30  ;;  %2461 = vmatmul.msk.f32.gmra.mxu2 %vm900_vm4, %v894_v56 }
 0x269   : > { %2582 = vst.msk [vmem:[%s3423_s13 + $0x1b0] sm:$0xff] %vm1206_vm6, %v2209_v31 }
 0x26a   : > { %1877 = vst.msk [vmem:[#allocation2 + $0xf0] sm:$0xff] %vm830_vm3, %v1812_v17 }
 0x26b   : > { %1302 = vst.msk [vmem:[#allocation2 + $0xf8] sm:$0xff] %vm248_vm0, %v3459_v12 }
 0x26c   : > { %1494 = vst.msk [vmem:[#allocation2 + $0xf8] sm:$0xff] %vm441_vm1, %v1430_v32 }
 0x26e   : > { %v2045_v33 = vpop.f32.mrf.mxu1  ;;  %v1588_v34 = vpop.permute.xlu1 %1587 }
 0x26f   : > { %v2046_v6 = vadd.f32 %v3408_v24, %v2045_v33  ;;  %v1396_v28 = vpop.permute.xlu0 %1395  ;;  %v1892_v35 = vld [vmem:[#allocation2 + $0x68] sm:$0xff]  ;;  %v3802_v24 = vld [vmem:[%s3902_s2] ss:$0 sm:$0xff] }
 0x270   : > { %1477 = vst.msk [vmem:[#allocation2 + $0x70] sm:$0xff] %vm441_vm1, %v1396_v28  ;;  %2541 = vmatmul.msk.f32.gmra.mxu1 %vm900_vm4, %v1892_v35 }
 0x271   : > { %vm2129_vm15 = vcmp.gt.f32.partialorder %v2046_v6, 0.0  ;;  %v2161_v19 = vmul.f32 0.01, %v2046_v6  ;;  %1669 = vst.msk [vmem:[#allocation2 + $0x70] sm:$0xff] %vm637_vm2, %v1588_v34  ;;  %v1909_v36 = vld [vmem:[#allocation2 + $0xf0] sm:$0xff] }
 0x272   : > { %2558 = vmatmul.msk.f32.gmra.mxu3 %vm900_vm4, %v1909_v36 }
 0x273   : > { %v2193_v12 = vsel %vm2129_vm15, %v2046_v6, %v2161_v19  ;;  %v2096_v37 = vpop.f32.mrf.mxu3 }
 0x274   : > { %2566 = vst.msk [vmem:[%s3423_s13 + $0x130] sm:$0xff] %vm1206_vm6, %v2193_v12  ;;  %v2097_v38 = vadd.f32 %v3802_v24, %v2096_v37 }
 0x276   : > { %vm2146_vm0 = vcmp.gt.f32.partialorder %v2097_v38, 0.0  ;;  %v2178_v25 = vmul.f32 0.01, %v2097_v38  ;;  %v1622_v40 = vpop.permute.xlu1 %1621 }
 0x277   : > { %1686 = vst.msk [vmem:[#allocation2 + $0xf8] sm:$0xff] %vm637_vm2, %v1622_v40  ;;  %v1780_v41 = vpop.permute.xlu0 %1779 }
 0x278   : > { %v2210_v42 = vsel %vm2146_vm0, %v2097_v38, %v2178_v25  ;;  %1861 = vst.msk [vmem:[#allocation2 + $0x70] sm:$0xff] %vm830_vm3, %v1780_v41 }
 0x279   : > { %2583 = vst.msk [vmem:[%s3423_s13 + $0x1b8] sm:$0xff] %vm1206_vm6, %v2210_v42 }
 0x27a   : > { %1878 = vst.msk [vmem:[#allocation2 + $0xf8] sm:$0xff] %vm830_vm3, %v1814_v0 }
 0x27e   : > { %v1590_v43 = vpop.permute.xlu1 %1589 }
 0x27f   : > { %v1398_v44 = vpop.permute.xlu0 %1397  ;;  %v1893_v45 = vld [vmem:[#allocation2 + $0x70] sm:$0xff] }
 0x280   : > { %v2048_v18 = vpop.f32.mrf.mxu1  ;;  %1478 = vst.msk [vmem:[#allocation2 + $0x78] sm:$0xff] %vm441_vm1, %v1398_v44  ;;  %2542 = vmatmul.msk.f32.gmra.mxu1 %vm900_vm4, %v1893_v45 }
 0x281   : > { %v2049_v46 = vadd.f32 %v3802_v24, %v2048_v18  ;;  %1670 = vst.msk [vmem:[#allocation2 + $0x78] sm:$0xff] %vm637_vm2, %v1590_v43  ;;  %v1910_v27 = vld [vmem:[#allocation2 + $0xf8] sm:$0xff] }
 0x282   : > { %1862 = vst.msk [vmem:[#allocation2 + $0x78] sm:$0xff] %vm830_vm3, %v1782_v8  ;;  %2559 = vmatmul.msk.f32.gmra.mxu3 %vm900_vm4, %v1910_v27 }
 0x283   : > { %vm2130_vm5 = vcmp.gt.f32.partialorder %v2049_v46, 0.0  ;;  %v2162_v47 = vmul.f32 0.01, %v2049_v46  ;;  %v2099_v48 = vpop.f32.mrf.mxu3 }
 0x284   : > { %v2100_v3 = vadd.f32 %v3802_v24, %v2099_v48 }
 0x285   : > { %v2194_v50 = vsel %vm2130_vm5, %v2049_v46, %v2162_v47 }
 0x286   : > { %2567 = vst.msk [vmem:[%s3423_s13 + $0x138] sm:$0xff] %vm1206_vm6, %v2194_v50  ;;  %vm2147_vm1 = vcmp.gt.f32.partialorder %v2100_v3, 0.0  ;;  %v2179_v51 = vmul.f32 0.01, %v2100_v3 }
 0x288   : > { %v2211_v20 = vsel %vm2147_vm1, %v2100_v3, %v2179_v51 }
 0x289   : > { %2584 = vst.msk [vmem:[%s3423_s13 + $0x1c0] sm:$0xff] %vm1206_vm6, %v2211_v20  ;;  %v1894_v52 = vld [vmem:[#allocation2 + $0x78] sm:$0xff] }
 0x28a   : > { %2543 = vmatmul.msk.f32.gmra.mxu1 %vm900_vm4, %v1894_v52  ;;  %v1092_v49 = vpop.f32.mrf.mxu2 }
 0x28b   : > { %v1093_v26 = vadd.f32 %v3802_v24, %v1092_v49 }
 0x28d   : > { %vm1136_vm2 = vcmp.gt.f32.partialorder %v1093_v26, 0.0  ;;  %v1168_v53 = vmul.f32 0.01, %v1093_v26  ;;  %v2051_v54 = vpop.f32.mrf.mxu1 }
 0x28e   : > { %v2052_v55 = vadd.f32 %v3802_v24, %v2051_v54 }
 0x28f   : > { %v1200_v2 = vsel %vm1136_vm2, %v1093_v26, %v1168_v53 }
 0x290   : > { %1233 = vst.msk [vmem:[%s3423_s13 + $0xd0] sm:$0xff] %vm1206_vm6, %v1200_v2  ;;  %vm2131_vm3 = vcmp.gt.f32.partialorder %v2052_v55, 0.0  ;;  %v2163_v57 = vmul.f32 0.01, %v2052_v55 }
 0x292   : > { %v2195_v58 = vsel %vm2131_vm3, %v2052_v55, %v2163_v57  ;;  %v1095_v22 = vpop.f32.mrf.mxu2 }
 0x293   : > { %2568 = vst.msk [vmem:[%s3423_s13 + $0x140] sm:$0xff] %vm1206_vm6, %v2195_v58  ;;  %v1096_v59 = vadd.f32 %v3802_v24, %v1095_v22 }
 0x295   : > { %vm1137_vm4 = vcmp.gt.f32.partialorder %v1096_v59, 0.0  ;;  %v1169_v60 = vmul.f32 0.01, %v1096_v59 }
 0x297   : > { %v1201_v61 = vsel %vm1137_vm4, %v1096_v59, %v1169_v60 }
 0x298   : > { %1234 = vst.msk [vmem:[%s3423_s13 + $0xd8] sm:$0xff] %vm1206_vm6, %v1201_v61 }
 0x29b   : > { %v2102_v62 = vpop.f32.mrf.mxu3 }
 0x29c   : > { %v2103_v10 = vadd.f32 %v3802_v24, %v2102_v62 }
 0x29e   : > { %vm2148_vm7 = vcmp.gt.f32.partialorder %v2103_v10, 0.0  ;;  %v2180_v4 = vmul.f32 0.01, %v2103_v10 }
 0x2a0   : > { %v2212_v5 = vsel %vm2148_vm7, %v2103_v10, %v2180_v4 }
 0x2a1   : > { %2585 = vst.msk [vmem:[%s3423_s13 + $0x1c8] sm:$0xff] %vm1206_vm6, %v2212_v5  ;;  %v2054_v11 = vpop.f32.mrf.mxu1 }
 0x2a2   : > { %v2055_v9 = vadd.f32 %v3802_v24, %v2054_v11 }
 0x2a4   : > { %vm2132_vm8 = vcmp.gt.f32.partialorder %v2055_v9, 0.0  ;;  %v2164_v13 = vmul.f32 0.01, %v2055_v9 }
 0x2a6   : > { %v2196_v14 = vsel %vm2132_vm8, %v2055_v9, %v2164_v13 }
 0x2a7   : > { %2569 = vst.msk [vmem:[%s3423_s13 + $0x148] sm:$0xff] %vm1206_vm6, %v2196_v14 }
 0x2ae   : > { %v2105_v21 = vpop.f32.mrf.mxu3 }
 0x2af   : > { %v2106_v16 = vadd.f32 %v3802_v24, %v2105_v21 }
 0x2b1   : > { %vm2149_vm9 = vcmp.gt.f32.partialorder %v2106_v16, 0.0  ;;  %v2181_v17 = vmul.f32 0.01, %v2106_v16 }
 0x2b3   : > { %v2213_v15 = vsel %vm2149_vm9, %v2106_v16, %v2181_v17  ;;  %v1098_v7 = vpop.f32.mrf.mxu2 }
 0x2b4   : > { %2586 = vst.msk [vmem:[%s3423_s13 + $0x1d0] sm:$0xff] %vm1206_vm6, %v2213_v15  ;;  %v1099_v63 = vadd.f32 %v3802_v24, %v1098_v7 }
 0x2b6   : > { %vm1138_vm10 = vcmp.gt.f32.partialorder %v1099_v63, 0.0  ;;  %v1170_v1 = vmul.f32 0.01, %v1099_v63 }
 0x2b8   : > { %v1202_v39 = vsel %vm1138_vm10, %v1099_v63, %v1170_v1  ;;  %v2057_v29 = vpop.f32.mrf.mxu1 }
 0x2b9   : > { %1235 = vst.msk [vmem:[%s3423_s13 + $0xe0] sm:$0xff] %vm1206_vm6, %v1202_v39  ;;  %v2058_v23 = vadd.f32 %v3802_v24, %v2057_v29 }
 0x2bb   : > { %vm2133_vm11 = vcmp.gt.f32.partialorder %v2058_v23, 0.0  ;;  %v2165_v30 = vmul.f32 0.01, %v2058_v23  ;;  %v2108_v56 = vpop.f32.mrf.mxu3 }
 0x2bc   : > { %v2109_v31 = vadd.f32 %v3802_v24, %v2108_v56 }
 0x2bd   : > { %v2197_v32 = vsel %vm2133_vm11, %v2058_v23, %v2165_v30 }
 0x2be   : > { %2570 = vst.msk [vmem:[%s3423_s13 + $0x150] sm:$0xff] %vm1206_vm6, %v2197_v32  ;;  %vm2150_vm12 = vcmp.gt.f32.partialorder %v2109_v31, 0.0  ;;  %v2182_v33 = vmul.f32 0.01, %v2109_v31 }
 0x2c0   : > { %v2214_v34 = vsel %vm2150_vm12, %v2109_v31, %v2182_v33 }
 0x2c1   : > { %2587 = vst.msk [vmem:[%s3423_s13 + $0x1d8] sm:$0xff] %vm1206_vm6, %v2214_v34 }
 0x2c2   : > { %v1101_v6 = vpop.f32.mrf.mxu2 }
 0x2c3   : > { %v1102_v28 = vadd.f32 %v3802_v24, %v1101_v6 }
 0x2c4   : > { %v2060_v35 = vpop.f32.mrf.mxu1 }
 0x2c5   : > { %vm1139_vm13 = vcmp.gt.f32.partialorder %v1102_v28, 0.0  ;;  %v1171_v19 = vmul.f32 0.01, %v1102_v28  ;;  %v2061_v36 = vadd.f32 %v3802_v24, %v2060_v35 }
 0x2c7   : > { %v1203_v12 = vsel %vm1139_vm13, %v1102_v28, %v1171_v19  ;;  %vm2134_vm14 = vcmp.gt.f32.partialorder %v2061_v36, 0.0  ;;  %v2166_v37 = vmul.f32 0.01, %v2061_v36 }
 0x2c8   : > { %1236 = vst.msk [vmem:[%s3423_s13 + $0xe8] sm:$0xff] %vm1206_vm6, %v1203_v12 }
 0x2c9   : > { %v2198_v38 = vsel %vm2134_vm14, %v2061_v36, %v2166_v37 }
 0x2ca   : > { %2571 = vst.msk [vmem:[%s3423_s13 + $0x158] sm:$0xff] %vm1206_vm6, %v2198_v38  ;;  %v1104_v0 = vpop.f32.mrf.mxu2 }
 0x2cb   : > { %v1105_v25 = vadd.f32 %v3802_v24, %v1104_v0 }
 0x2cd   : > { %vm1140_vm15 = vcmp.gt.f32.partialorder %v1105_v25, 0.0  ;;  %v1172_v40 = vmul.f32 0.01, %v1105_v25 }
 0x2cf   : > { %v1204_v41 = vsel %vm1140_vm15, %v1105_v25, %v1172_v40 }
 0x2d0   : > { %1237 = vst.msk [vmem:[%s3423_s13 + $0xf0] sm:$0xff] %vm1206_vm6, %v1204_v41 }
 0x2d3   : > { %v2111_v42 = vpop.f32.mrf.mxu3 }
 0x2d4   : > { %v2112_v43 = vadd.f32 %v3802_v24, %v2111_v42 }
 0x2d6   : > { %vm2151_vm0 = vcmp.gt.f32.partialorder %v2112_v43, 0.0  ;;  %v2183_v44 = vmul.f32 0.01, %v2112_v43  ;;  %v2063_v45 = vpop.f32.mrf.mxu1 }
 0x2d7   : > { %v2064_v8 = vadd.f32 %v3802_v24, %v2063_v45 }
 0x2d8   : > { %v2215_v18 = vsel %vm2151_vm0, %v2112_v43, %v2183_v44 }
 0x2d9   : > { %2588 = vst.msk [vmem:[%s3423_s13 + $0x1e0] sm:$0xff] %vm1206_vm6, %v2215_v18  ;;  %vm2135_vm5 = vcmp.gt.f32.partialorder %v2064_v8, 0.0  ;;  %v2167_v46 = vmul.f32 0.01, %v2064_v8 }
 0x2db   : > { %v2199_v27 = vsel %vm2135_vm5, %v2064_v8, %v2167_v46 }
 0x2dc   : > { %2572 = vst.msk [vmem:[%s3423_s13 + $0x160] sm:$0xff] %vm1206_vm6, %v2199_v27 }
 0x2e5   : > { %v2114_v47 = vpop.f32.mrf.mxu3 }
 0x2e6   : > { %v2115_v48 = vadd.f32 %v3802_v24, %v2114_v47 }
 0x2e8   : > { %vm2152_vm1 = vcmp.gt.f32.partialorder %v2115_v48, 0.0  ;;  %v2184_v3 = vmul.f32 0.01, %v2115_v48 }
 0x2ea   : > { %v2216_v50 = vsel %vm2152_vm1, %v2115_v48, %v2184_v3 }
 0x2eb   : > { %2589 = vst.msk [vmem:[%s3423_s13 + $0x1e8] sm:$0xff] %vm1206_vm6, %v2216_v50  ;;  %v1107_v51 = vpop.f32.mrf.mxu2 }
 0x2ec   : > { %v1108_v20 = vadd.f32 %v3802_v24, %v1107_v51 }
 0x2ed   : > { %v2066_v52 = vpop.f32.mrf.mxu1 }
 0x2ee   : > { %vm1141_vm2 = vcmp.gt.f32.partialorder %v1108_v20, 0.0  ;;  %v1173_v49 = vmul.f32 0.01, %v1108_v20  ;;  %v2067_v26 = vadd.f32 %v3802_v24, %v2066_v52 }
 0x2f0   : > { %v1205_v53 = vsel %vm1141_vm2, %v1108_v20, %v1173_v49  ;;  %vm2136_vm3 = vcmp.gt.f32.partialorder %v2067_v26, 0.0  ;;  %v2168_v54 = vmul.f32 0.01, %v2067_v26 }
 0x2f1   : > { %1238 = vst.msk [vmem:[%s3423_s13 + $0xf8] sm:$0xff] %vm1206_vm6, %v1205_v53 }
 0x2f2   : > { %v2200_v55 = vsel %vm2136_vm3, %v2067_v26, %v2168_v54 }
 0x2f3   : > { %2573 = vst.msk [vmem:[%s3423_s13 + $0x168] sm:$0xff] %vm1206_vm6, %v2200_v55 }
 0x2f5   : > { %v2117_v2 = vpop.f32.mrf.mxu3 }
 0x2f6   : > { %v2118_v57 = vadd.f32 %v3802_v24, %v2117_v2 }
 0x2f8   : > { %vm2153_vm4 = vcmp.gt.f32.partialorder %v2118_v57, 0.0  ;;  %v2185_v58 = vmul.f32 0.01, %v2118_v57 }
 0x2fa   : > { %v2217_v22 = vsel %vm2153_vm4, %v2118_v57, %v2185_v58 }
 0x2fb   : > { %2590 = vst.msk [vmem:[%s3423_s13 + $0x1f0] sm:$0xff] %vm1206_vm6, %v2217_v22 }
 0x2fd   : > { %v2069_v59 = vpop.f32.mrf.mxu1 }
 0x2fe   : > { %v2070_v60 = vadd.f32 %v3802_v24, %v2069_v59 }
 0x300   : > { %vm2137_vm7 = vcmp.gt.f32.partialorder %v2070_v60, 0.0  ;;  %v2169_v61 = vmul.f32 0.01, %v2070_v60 }
 0x302   : > { %v2201_v62 = vsel %vm2137_vm7, %v2070_v60, %v2169_v61 }
 0x303   : > { %2574 = vst.msk [vmem:[%s3423_s13 + $0x170] sm:$0xff] %vm1206_vm6, %v2201_v62 }
 0x305   : > { %v2120_v10 = vpop.f32.mrf.mxu3 }
 0x306   : > { %v2121_v4 = vadd.f32 %v3802_v24, %v2120_v10 }
 0x307   : > { %v2072_v5 = vpop.f32.mrf.mxu1 }
 0x308   : > { %vm2154_vm8 = vcmp.gt.f32.partialorder %v2121_v4, 0.0  ;;  %v2186_v11 = vmul.f32 0.01, %v2121_v4  ;;  %v2073_v9 = vadd.f32 %v3802_v24, %v2072_v5 }
 0x30a   : > { %v2218_v13 = vsel %vm2154_vm8, %v2121_v4, %v2186_v11  ;;  %vm2138_vm9 = vcmp.gt.f32.partialorder %v2073_v9, 0.0  ;;  %v2170_v14 = vmul.f32 0.01, %v2073_v9 }
 0x30b   : > { %2591 = vst.msk [vmem:[%s3423_s13 + $0x1f8] sm:$0xff] %vm1206_vm6, %v2218_v13 }
 0x30c   : > { %v2202_v21 = vsel %vm2138_vm9, %v2073_v9, %v2170_v14 }
 0x30d   : > { %2575 = vst.msk [vmem:[%s3423_s13 + $0x178] sm:$0xff] %vm1206_vm6, %v2202_v21 }
 0x30e PF: > { %s13_s16 = sadd.s32 1, %s2683_s16   ;;  %s3904_s12 = smov %s2675_s14 }
 0x30f   : > { %p10_p7 = scmp.ge.s32.totalorder %s13_s16, 6   ;;  %s3905_s13 = smov %s2679_s15 }
 0x310   : > { %s3906_s14 = smov %s3909_s17  ;;  %s3907_s15 = smov %s3913_s18 }
 0x311   :  { %12 = sbr.rel (!%p10_p7) target bundleno = 3 (0x3), region = 69 }

</bundles_post_ra>
